<compile_context>
chip_gen: v7x
topology: tpu7x:2x2x1
jax: 0.10.0
libtpu: 0.0.40
codegen_flags: <defaults>
</compile_context>

<pallas_src>
import functools
import math

import jax
import jax.numpy as jnp
from jax import lax
from jax.experimental import pallas as pl
from jax.experimental.pallas import tpu as pltpu

# ---------------- small synthetic config ----------------
HIDDEN = 32
N_HEADS = 4
N_KV_HEADS = 2
HEAD_DIM = HIDDEN // N_HEADS          # 8
HALF_DIM = HEAD_DIM // 2              # 4
N_REP = N_HEADS // N_KV_HEADS         # 2  (GQA repeat factor)
INTERMEDIATE = 64
RMS_EPS = 1e-6
ROPE_THETA = 10000.0
B = 2
S = 8
QKV_OUT = (N_HEADS + 2 * N_KV_HEADS) * HEAD_DIM   # 64
QW = N_HEADS * HALF_DIM               # 16  (Q half-slab width)
KW = N_KV_HEADS * HALF_DIM            # 8   (K half-slab width)
ROPE_W = 2 * QW + 2 * KW              # 48: [cos_q*s | sin_q*s | cos_k | sin_k]
NEG_INF = float(jnp.finfo(jnp.float32).min)       # torch.finfo(fp32).min
INV_SQRT_D = 1.0 / math.sqrt(HEAD_DIM)

# TODO(synk): the KVmix int-packed quantized cache path (quantize_pack_last_dim
# / quantized_gemm) only affects the returned KV cache; with past_key_value=None
# and use_cache=False it has no effect on the layer output and is not emitted.


def _tensorcores_per_device() -> int:
    """Best-effort query of TensorCores per device (v7x / megacore -> 2)."""
    try:
        dev = jax.devices()[0]
    except Exception:
        return 1
    for attr in ("num_cores", "core_count", "num_tensor_cores"):
        val = getattr(dev, attr, None)
        if isinstance(val, int) and val > 0:
            return val
    return 1


# ---------------- fused decoder-layer kernel ----------------
def _rmsnorm(x, w):
    var = jnp.mean(x * x, axis=-1, keepdims=True)
    return x * lax.rsqrt(var + RMS_EPS) * w


def _decoder_layer_kernel(x_ref, rope_ref, ln_ref, wqkv_ref, wo_ref, wgu_ref,
                          wd_ref, out_ref, *, seq_len):
    rows = x_ref.shape[0]              # batches_per_step * seq_len (static)
    nb = rows // seq_len               # batches handled by this grid step

    x = x_ref[...]                     # (rows, H)   f32
    rope = rope_ref[...]               # (rows, 48)  f32
    lnw = ln_ref[...]                  # (2, H)      f32

    cos_q = rope[:, :QW]               # pre-scaled by 1/sqrt(head_dim)
    sin_q = rope[:, QW:2 * QW]
    cos_k = rope[:, 2 * QW:2 * QW + KW]
    sin_k = rope[:, 2 * QW + KW:]

    # ---- self-attention block ----
    xn = _rmsnorm(x, lnw[0:1, :])
    qkv = jnp.dot(xn.astype(jnp.bfloat16), wqkv_ref[...],
                  preferred_element_type=jnp.float32)      # (rows, 64)

    # Q/K are in half-blocked layout (weight columns permuted offline).
    q1 = qkv[:, :QW]
    q2 = qkv[:, QW:2 * QW]
    k1 = qkv[:, 2 * QW:2 * QW + KW]
    k2 = qkv[:, 2 * QW + KW:2 * QW + 2 * KW]
    v = qkv[:, 2 * QW + 2 * KW:]                           # (rows, NKV*D)

    # slab-wide RoPE (rotate_half form on halves; scale folded into cos_q/sin_q)
    qr1 = q1 * cos_q - q2 * sin_q
    qr2 = q2 * cos_q + q1 * sin_q
    kr1 = k1 * cos_k - k2 * sin_k
    kr2 = k2 * cos_k + k1 * sin_k
    vb = v.astype(jnp.bfloat16)

    # causal additive mask generated in-kernel (no HBM mask traffic)
    # TODO(synk): arbitrary padded attention masks would arrive as an extra
    # input; the module's reference caller builds exactly this causal mask.
    r = lax.broadcasted_iota(jnp.int32, (seq_len, seq_len), 0)
    c = lax.broadcasted_iota(jnp.int32, (seq_len, seq_len), 1)
    mask = jnp.where(c <= r, 0.0, NEG_INF).astype(jnp.float32)

    nt = (((1,), (1,)), ((), ()))      # contract last dims: A @ B^T

    attn_rows = []
    for b in range(nb):                # static unrolled loop (nb in {1, B})
        rs = b * seq_len
        # rotated K per kv-head, halves concatenated back to full head_dim
        k_heads = []
        for g in range(N_KV_HEADS):
            kh = jnp.concatenate(
                [kr1[rs:rs + seq_len, g * HALF_DIM:(g + 1) * HALF_DIM],
                 kr2[rs:rs + seq_len, g * HALF_DIM:(g + 1) * HALF_DIM]],
                axis=-1)
            k_heads.append(kh.astype(jnp.bfloat16))

        ctxs = []
        for h in range(N_HEADS):
            g = h // N_REP                                  # GQA kv-head index
            qh = jnp.concatenate(
                [qr1[rs:rs + seq_len, h * HALF_DIM:(h + 1) * HALF_DIM],
                 qr2[rs:rs + seq_len, h * HALF_DIM:(h + 1) * HALF_DIM]],
                axis=-1).astype(jnp.bfloat16)

            # single (S,D)@(S,D)^T score dot per head (already 1/sqrt(D)-scaled)
            scores = lax.dot_general(qh, k_heads[g], nt,
                                     preferred_element_type=jnp.float32)
            scores = scores + mask
            # fp32 max-subtracted softmax (makes the finfo.min clamp redundant)
            scores = scores - jnp.max(scores, axis=-1, keepdims=True)
            p = jnp.exp(scores)
            p = p * pl.reciprocal(jnp.sum(p, axis=-1, keepdims=True),
                                  approx=True)

            ctx = jnp.dot(p.astype(jnp.bfloat16),
                          vb[rs:rs + seq_len, g * HEAD_DIM:(g + 1) * HEAD_DIM],
                          preferred_element_type=jnp.float32)   # (S, D)
            ctxs.append(ctx)

        attn_rows.append(jnp.concatenate(ctxs, axis=-1))    # (S, H)

    attn = attn_rows[0] if nb == 1 else jnp.concatenate(attn_rows, axis=0)

    # single o_proj matmul over all rows / heads
    attn_proj = jnp.dot(attn.astype(jnp.bfloat16), wo_ref[...],
                        preferred_element_type=jnp.float32)
    h1 = x + attn_proj                                      # residual 1

    # ---- MLP block ----
    xn2 = _rmsnorm(h1, lnw[1:2, :])
    gu = jnp.dot(xn2.astype(jnp.bfloat16), wgu_ref[...],
                 preferred_element_type=jnp.float32)        # (rows, 2*I)
    gate = gu[:, :INTERMEDIATE]
    up = gu[:, INTERMEDIATE:]
    act = gate * pl.reciprocal(1.0 + jnp.exp(-gate), approx=True) * up
    out = h1 + jnp.dot(act.astype(jnp.bfloat16), wd_ref[...],
                       preferred_element_type=jnp.float32)  # residual 2

    out_ref[...] = out


def _build_rope_table(position_ids):
    """(B, S, 48) = [cos*INV_SQRT_D tiled over Q heads | sin*INV_SQRT_D tiled |
                     cos tiled over KV heads | sin tiled]."""
    inv_freq = 1.0 / (ROPE_THETA ** (jnp.arange(0, HEAD_DIM, 2,
                                                dtype=jnp.float32) / HEAD_DIM))
    freqs = position_ids.astype(jnp.float32)[..., None] * inv_freq[None, None, :]
    cos = jnp.cos(freqs)                                    # (B, S, HALF)
    sin = jnp.sin(freqs)
    cos_q = jnp.tile(cos, (1, 1, N_HEADS)) * INV_SQRT_D
    sin_q = jnp.tile(sin, (1, 1, N_HEADS)) * INV_SQRT_D
    cos_k = jnp.tile(cos, (1, 1, N_KV_HEADS))
    sin_k = jnp.tile(sin, (1, 1, N_KV_HEADS))
    return jnp.concatenate([cos_q, sin_q, cos_k, sin_k], axis=-1)


def decoder_layer_forward(hidden_states, params, position_ids, *, cores=None):
    Bz, Sq, H = hidden_states.shape
    if cores is None:
        cores = _tensorcores_per_device()

    # Fold the batch into one grid step on single-TC chips (v5e/v6e); keep one
    # batch per grid step with "parallel" semantics when >=2 TCs (v7x/megacore).
    bps = 1 if (cores >= 2 and Bz > 1) else Bz
    grid_b = Bz // bps
    rows = bps * Sq

    rope = _build_rope_table(position_ids)                  # (B, S, 48)
    x2 = hidden_states.reshape(Bz * Sq, H)                  # lane/sublane-dense
    rope2 = rope.reshape(Bz * Sq, ROPE_W)

    kernel = functools.partial(_decoder_layer_kernel, seq_len=Sq)

    out2 = pl.pallas_call(
        kernel,
        out_shape=jax.ShapeDtypeStruct((Bz * Sq, H), jnp.float32),
        grid=(grid_b,),
        in_specs=[
            pl.BlockSpec((rows, H), lambda i: (i, 0)),                 # hidden
            pl.BlockSpec((rows, ROPE_W), lambda i: (i, 0)),            # rope
            pl.BlockSpec((2, H), lambda i: (0, 0)),                    # ln(2,H)
            pl.BlockSpec((H, QKV_OUT), lambda i: (0, 0)),              # Wqkv
            pl.BlockSpec((H, H), lambda i: (0, 0)),                    # Wo
            pl.BlockSpec((H, 2 * INTERMEDIATE), lambda i: (0, 0)),     # Wg|Wu
            pl.BlockSpec((INTERMEDIATE, H), lambda i: (0, 0)),         # Wd
        ],
        out_specs=pl.BlockSpec((rows, H), lambda i: (i, 0)),
        compiler_params=pltpu.CompilerParams(
            dimension_semantics=("parallel",)),
    )(x2, rope2, params["ln"], params["wqkv"], params["wo"],
      params["wgu"], params["wd"])

    return out2.reshape(Bz, Sq, H)


# ---------------- deterministic parameter init ----------------
def init_raw_params(key):
    ks = jax.random.split(key, 7)
    scale = 0.02
    return {
        "input_ln": jnp.ones((HIDDEN,), jnp.float32),
        "post_ln": jnp.ones((HIDDEN,), jnp.float32),
        "wq": scale * jax.random.normal(ks[0], (HIDDEN, N_HEADS * HEAD_DIM), jnp.float32),
        "wk": scale * jax.random.normal(ks[1], (HIDDEN, N_KV_HEADS * HEAD_DIM), jnp.float32),
        "wv": scale * jax.random.normal(ks[2], (HIDDEN, N_KV_HEADS * HEAD_DIM), jnp.float32),
        "wo": scale * jax.random.normal(ks[3], (N_HEADS * HEAD_DIM, HIDDEN), jnp.float32),
        "wg": scale * jax.random.normal(ks[4], (HIDDEN, INTERMEDIATE), jnp.float32),
        "wu": scale * jax.random.normal(ks[5], (HIDDEN, INTERMEDIATE), jnp.float32),
        "wd": scale * jax.random.normal(ks[6], (INTERMEDIATE, HIDDEN), jnp.float32),
    }


def fuse_params(rp):
    """One-time offline fusion:
       * Q/K weight columns permuted into half-blocked layout
         ([head0_half0 .. headN_half0 | head0_half1 .. headN_half1]) so RoPE is
         applied slab-wide in the kernel,
       * q|k|v and gate|up fused into single matrices,
       * both layernorm weights stacked into one (2, H) block,
       * matmul weights stored as bf16 (native MXU input; f32 accumulation)."""
    H, NH, NKV, HALF = HIDDEN, N_HEADS, N_KV_HEADS, HALF_DIM
    wq_hb = rp["wq"].reshape(H, NH, 2, HALF).transpose(0, 2, 1, 3).reshape(H, NH * HEAD_DIM)
    wk_hb = rp["wk"].reshape(H, NKV, 2, HALF).transpose(0, 2, 1, 3).reshape(H, NKV * HEAD_DIM)
    return {
        "ln": jnp.stack([rp["input_ln"], rp["post_ln"]], axis=0),          # (2,H) f32
        "wqkv": jnp.concatenate([wq_hb, wk_hb, rp["wv"]], axis=1).astype(jnp.bfloat16),
        "wo": rp["wo"].astype(jnp.bfloat16),
        "wgu": jnp.concatenate([rp["wg"], rp["wu"]], axis=1).astype(jnp.bfloat16),
        "wd": rp["wd"].astype(jnp.bfloat16),
    }


# ---------------- pure-JAX reference (numerical sanity check) ----------------
def reference_forward(x, rp, position_ids):
    hp = jax.lax.Precision.HIGHEST
    Bz, Sq, H = x.shape

    def rms(v, w):
        var = jnp.mean(v * v, axis=-1, keepdims=True)
        return v * jax.lax.rsqrt(var + RMS_EPS) * w

    residual = x
    xn = rms(x, rp["input_ln"])
    q = jnp.dot(xn, rp["wq"], precision=hp).reshape(Bz, Sq, N_HEADS, HEAD_DIM).transpose(0, 2, 1, 3)
    k = jnp.dot(xn, rp["wk"], precision=hp).reshape(Bz, Sq, N_KV_HEADS, HEAD_DIM).transpose(0, 2, 1, 3)
    v = jnp.dot(xn, rp["wv"], precision=hp).reshape(Bz, Sq, N_KV_HEADS, HEAD_DIM).transpose(0, 2, 1, 3)

    inv_freq = 1.0 / (ROPE_THETA ** (jnp.arange(0, HEAD_DIM, 2, dtype=jnp.float32) / HEAD_DIM))
    freqs = position_ids.astype(jnp.float32)[..., None] * inv_freq
    emb = jnp.concatenate([freqs, freqs], axis=-1)
    cos = jnp.cos(emb)[:, None, :, :]
    sin = jnp.sin(emb)[:, None, :, :]

    def rot_half(t):
        return jnp.concatenate([-t[..., HEAD_DIM // 2:], t[..., :HEAD_DIM // 2]], axis=-1)

    q = q * cos + rot_half(q) * sin
    k = k * cos + rot_half(k) * sin
    k = jnp.repeat(k, N_REP, axis=1)
    v = jnp.repeat(v, N_REP, axis=1)

    scores = jnp.einsum("bhqd,bhkd->bhqk", q, k, precision=hp) / math.sqrt(HEAD_DIM)
    i = jnp.arange(Sq)[:, None]
    j = jnp.arange(Sq)[None, :]
    mask = jnp.where(j <= i, 0.0, NEG_INF).astype(jnp.float32)
    scores = jnp.maximum(scores + mask, NEG_INF)
    p = jax.nn.softmax(scores, axis=-1)
    ctx = jnp.einsum("bhqk,bhkd->bhqd", p, v, precision=hp)
    attn = ctx.transpose(0, 2, 1, 3).reshape(Bz, Sq, H)
    h1 = residual + jnp.dot(attn, rp["wo"], precision=hp)

    xn2 = rms(h1, rp["post_ln"])
    g = jnp.dot(xn2, rp["wg"], precision=hp)
    u = jnp.dot(xn2, rp["wu"], precision=hp)
    act = g * jax.nn.sigmoid(g) * u
    return h1 + jnp.dot(act, rp["wd"], precision=hp)


if __name__ == "__main__":
    key = jax.random.PRNGKey(0)
    pkey, xkey = jax.random.split(key)
    raw_params = init_raw_params(pkey)
    fused_params = fuse_params(raw_params)

    hidden_states = jax.random.normal(xkey, (B, S, HIDDEN), jnp.float32)
    position_ids = jnp.broadcast_to(jnp.arange(S, dtype=jnp.int32)[None, :], (B, S))

    fwd = jax.jit(decoder_layer_forward)
    out = jax.block_until_ready(fwd(hidden_states, fused_params, position_ids))

    assert out.shape == (B, S, HIDDEN)
    assert bool(jnp.all(jnp.isfinite(out)))

    ref = reference_forward(hidden_states, raw_params, position_ids)
    max_err = float(jnp.max(jnp.abs(out - ref)))
    assert max_err < 5e-3, f"max abs error vs reference: {max_err}"

    print("KERNEL_OK")
</pallas_src>

<mosaic_0001>
module attributes {stable_mosaic.version = 11 : i64} {
  func.func @_decoder_layer_kernel(%arg0: i32, %arg1: memref<16x32xf32, #tpu.memory_space<vmem>>, %arg2: memref<16x48xf32, #tpu.memory_space<vmem>>, %arg3: memref<2x32xf32, #tpu.memory_space<vmem>>, %arg4: memref<32x64xbf16, #tpu.memory_space<vmem>>, %arg5: memref<32x32xbf16, #tpu.memory_space<vmem>>, %arg6: memref<32x128xbf16, #tpu.memory_space<vmem>>, %arg7: memref<64x32xbf16, #tpu.memory_space<vmem>>, %arg8: memref<16x32xf32, #tpu.memory_space<vmem>>) attributes {dimension_semantics = [#tpu.dimension_semantics<parallel>], iteration_bounds = array<i64: 1>, scalar_prefetch = 0 : i64, scratch_operands = 0 : i64, tpu.core_type = #tpu.core_type<tc>, window_params = [{transform_indices = @transform_0, window_bounds = array<i64: 16, 32>}, {transform_indices = @transform_1, window_bounds = array<i64: 16, 48>}, {pipeline_mode = #tpu.pipeline_mode<synchronous>, transform_indices = @transform_2, window_bounds = array<i64: 2, 32>}, {pipeline_mode = #tpu.pipeline_mode<synchronous>, transform_indices = @transform_3, window_bounds = array<i64: 32, 64>}, {pipeline_mode = #tpu.pipeline_mode<synchronous>, transform_indices = @transform_4, window_bounds = array<i64: 32, 32>}, {pipeline_mode = #tpu.pipeline_mode<synchronous>, transform_indices = @transform_5, window_bounds = array<i64: 32, 128>}, {pipeline_mode = #tpu.pipeline_mode<synchronous>, transform_indices = @transform_6, window_bounds = array<i64: 64, 32>}, {transform_indices = @transform_7, window_bounds = array<i64: 16, 32>}]} {
    %c0 = arith.constant 0 : index
    %c0_0 = arith.constant 0 : index
    %0 = vector.load %arg1[%c0, %c0_0] : memref<16x32xf32, #tpu.memory_space<vmem>>, vector<16x32xf32>
    %c0_1 = arith.constant 0 : index
    %c0_2 = arith.constant 0 : index
    %1 = vector.load %arg2[%c0_1, %c0_2] : memref<16x48xf32, #tpu.memory_space<vmem>>, vector<16x48xf32>
    %c0_3 = arith.constant 0 : index
    %c0_4 = arith.constant 0 : index
    %2 = vector.load %arg3[%c0_3, %c0_4] : memref<2x32xf32, #tpu.memory_space<vmem>>, vector<2x32xf32>
    %3 = vector.extract_strided_slice %1 {offsets = [0, 0], sizes = [16, 16], strides = [1, 1]} : vector<16x48xf32> to vector<16x16xf32>
    %4 = vector.extract_strided_slice %1 {offsets = [0, 16], sizes = [16, 16], strides = [1, 1]} : vector<16x48xf32> to vector<16x16xf32>
    %5 = vector.extract_strided_slice %1 {offsets = [0, 32], sizes = [16, 8], strides = [1, 1]} : vector<16x48xf32> to vector<16x8xf32>
    %6 = vector.extract_strided_slice %1 {offsets = [0, 40], sizes = [16, 8], strides = [1, 1]} : vector<16x48xf32> to vector<16x8xf32>
    %7 = vector.extract_strided_slice %2 {offsets = [0, 0], sizes = [1, 32], strides = [1, 1]} : vector<2x32xf32> to vector<1x32xf32>
    %8 = arith.mulf %0, %0 : vector<16x32xf32>
    %cst = arith.constant dense<0.000000e+00> : vector<16xf32>
    %9 = vector.multi_reduction <add>, %8, %cst [1] : vector<16x32xf32> to vector<16xf32>
    %10 = vector.shape_cast %9 : vector<16xf32> to vector<16x1xf32>
    %cst_5 = arith.constant 3.200000e+01 : f32
    %11 = vector.broadcast %cst_5 : f32 to vector<16x1xf32>
    %12 = arith.divf %10, %11 : vector<16x1xf32>
    %cst_6 = arith.constant 9.99999997E-7 : f32
    %13 = vector.broadcast %cst_6 : f32 to vector<16x1xf32>
    %14 = arith.addf %12, %13 : vector<16x1xf32>
    %15 = math.rsqrt %14 : vector<16x1xf32>
    %16 = vector.broadcast %15 : vector<16x1xf32> to vector<16x32xf32>
    %17 = arith.mulf %0, %16 : vector<16x32xf32>
    %18 = vector.broadcast %7 : vector<1x32xf32> to vector<16x32xf32>
    %19 = arith.mulf %17, %18 : vector<16x32xf32>
    %20 = arith.truncf %19 : vector<16x32xf32> to vector<16x32xbf16>
    %c0_7 = arith.constant 0 : index
    %c0_8 = arith.constant 0 : index
    %21 = vector.load %arg4[%c0_7, %c0_8] : memref<32x64xbf16, #tpu.memory_space<vmem>>, vector<32x64xbf16>
    %cst_9 = arith.constant dense<0.000000e+00> : vector<16x64xf32>
    %22 = tpu.matmul %20, %21, %cst_9 {dimension_numbers = #tpu.dot_dimension_numbers<[1], [0], [0], [1], [0, 0, 1, 1], [], []>} : vector<16x32xbf16>, vector<32x64xbf16>, vector<16x64xf32> -> vector<16x64xf32>
    %23 = vector.extract_strided_slice %22 {offsets = [0, 0], sizes = [16, 16], strides = [1, 1]} : vector<16x64xf32> to vector<16x16xf32>
    %24 = vector.extract_strided_slice %22 {offsets = [0, 16], sizes = [16, 16], strides = [1, 1]} : vector<16x64xf32> to vector<16x16xf32>
    %25 = vector.extract_strided_slice %22 {offsets = [0, 32], sizes = [16, 8], strides = [1, 1]} : vector<16x64xf32> to vector<16x8xf32>
    %26 = vector.extract_strided_slice %22 {offsets = [0, 40], sizes = [16, 8], strides = [1, 1]} : vector<16x64xf32> to vector<16x8xf32>
    %27 = vector.extract_strided_slice %22 {offsets = [0, 48], sizes = [16, 16], strides = [1, 1]} : vector<16x64xf32> to vector<16x16xf32>
    %28 = arith.mulf %23, %3 : vector<16x16xf32>
    %29 = arith.mulf %24, %4 : vector<16x16xf32>
    %30 = arith.subf %28, %29 : vector<16x16xf32>
    %31 = arith.mulf %24, %3 : vector<16x16xf32>
    %32 = arith.mulf %23, %4 : vector<16x16xf32>
    %33 = arith.addf %31, %32 : vector<16x16xf32>
    %34 = arith.mulf %25, %5 : vector<16x8xf32>
    %35 = arith.mulf %26, %6 : vector<16x8xf32>
    %36 = arith.subf %34, %35 : vector<16x8xf32>
    %37 = arith.mulf %26, %5 : vector<16x8xf32>
    %38 = arith.mulf %25, %6 : vector<16x8xf32>
    %39 = arith.addf %37, %38 : vector<16x8xf32>
    %40 = arith.truncf %27 : vector<16x16xf32> to vector<16x16xbf16>
    %41 = tpu.iota {dimensions = array<i32: 0>} : vector<8x8xi32>
    %42 = tpu.iota {dimensions = array<i32: 1>} : vector<8x8xi32>
    %43 = arith.cmpi sle, %42, %41 : vector<8x8xi32>
    %cst_10 = arith.constant 0.000000e+00 : f32
    %cst_11 = arith.constant -3.40282347E+38 : f32
    %44 = vector.broadcast %cst_10 : f32 to vector<8x8xf32>
    %45 = vector.broadcast %cst_11 : f32 to vector<8x8xf32>
    %46 = arith.select %43, %44, %45 : vector<8x8xi1>, vector<8x8xf32>
    %47 = vector.extract_strided_slice %36 {offsets = [0, 0], sizes = [8, 4], strides = [1, 1]} : vector<16x8xf32> to vector<8x4xf32>
    %48 = vector.extract_strided_slice %39 {offsets = [0, 0], sizes = [8, 4], strides = [1, 1]} : vector<16x8xf32> to vector<8x4xf32>
    %49 = tpu.concatenate %47, %48 in 1 : vector<8x4xf32>, vector<8x4xf32> -> vector<8x8xf32>
    %50 = arith.truncf %49 : vector<8x8xf32> to vector<8x8xbf16>
    %51 = vector.extract_strided_slice %36 {offsets = [0, 4], sizes = [8, 4], strides = [1, 1]} : vector<16x8xf32> to vector<8x4xf32>
    %52 = vector.extract_strided_slice %39 {offsets = [0, 4], sizes = [8, 4], strides = [1, 1]} : vector<16x8xf32> to vector<8x4xf32>
    %53 = tpu.concatenate %51, %52 in 1 : vector<8x4xf32>, vector<8x4xf32> -> vector<8x8xf32>
    %54 = arith.truncf %53 : vector<8x8xf32> to vector<8x8xbf16>
    %55 = vector.extract_strided_slice %30 {offsets = [0, 0], sizes = [8, 4], strides = [1, 1]} : vector<16x16xf32> to vector<8x4xf32>
    %56 = vector.extract_strided_slice %33 {offsets = [0, 0], sizes = [8, 4], strides = [1, 1]} : vector<16x16xf32> to vector<8x4xf32>
    %57 = tpu.concatenate %55, %56 in 1 : vector<8x4xf32>, vector<8x4xf32> -> vector<8x8xf32>
    %58 = arith.truncf %57 : vector<8x8xf32> to vector<8x8xbf16>
    %cst_12 = arith.constant dense<0.000000e+00> : vector<8x8xf32>
    %59 = tpu.matmul %58, %50, %cst_12 {dimension_numbers = #tpu.dot_dimension_numbers<[1], [1], [0], [0], [0, 0, 1, 0], [], []>} : vector<8x8xbf16>, vector<8x8xbf16>, vector<8x8xf32> -> vector<8x8xf32>
    %60 = arith.addf %59, %46 : vector<8x8xf32>
    %cst_13 = arith.constant dense<0xFF800000> : vector<8xf32>
    %61 = vector.multi_reduction <maximumf>, %60, %cst_13 [1] : vector<8x8xf32> to vector<8xf32>
    %62 = vector.shape_cast %61 : vector<8xf32> to vector<8x1xf32>
    %63 = vector.broadcast %62 : vector<8x1xf32> to vector<8x8xf32>
    %64 = arith.subf %60, %63 : vector<8x8xf32>
    %65 = math.exp %64 : vector<8x8xf32>
    %cst_14 = arith.constant dense<0.000000e+00> : vector<8xf32>
    %66 = vector.multi_reduction <add>, %65, %cst_14 [1] : vector<8x8xf32> to vector<8xf32>
    %67 = vector.shape_cast %66 : vector<8xf32> to vector<8x1xf32>
    %68 = tpu.reciprocal %67 {approx = true} : vector<8x1xf32> -> vector<8x1xf32>
    %69 = vector.broadcast %68 : vector<8x1xf32> to vector<8x8xf32>
    %70 = arith.mulf %65, %69 : vector<8x8xf32>
    %71 = arith.truncf %70 : vector<8x8xf32> to vector<8x8xbf16>
    %72 = vector.extract_strided_slice %40 {offsets = [0, 0], sizes = [8, 8], strides = [1, 1]} : vector<16x16xbf16> to vector<8x8xbf16>
    %cst_15 = arith.constant dense<0.000000e+00> : vector<8x8xf32>
    %73 = tpu.matmul %71, %72, %cst_15 {dimension_numbers = #tpu.dot_dimension_numbers<[1], [0], [0], [1], [0, 0, 1, 1], [], []>} : vector<8x8xbf16>, vector<8x8xbf16>, vector<8x8xf32> -> vector<8x8xf32>
    %74 = vector.extract_strided_slice %30 {offsets = [0, 4], sizes = [8, 4], strides = [1, 1]} : vector<16x16xf32> to vector<8x4xf32>
    %75 = vector.extract_strided_slice %33 {offsets = [0, 4], sizes = [8, 4], strides = [1, 1]} : vector<16x16xf32> to vector<8x4xf32>
    %76 = tpu.concatenate %74, %75 in 1 : vector<8x4xf32>, vector<8x4xf32> -> vector<8x8xf32>
    %77 = arith.truncf %76 : vector<8x8xf32> to vector<8x8xbf16>
    %cst_16 = arith.constant dense<0.000000e+00> : vector<8x8xf32>
    %78 = tpu.matmul %77, %50, %cst_16 {dimension_numbers = #tpu.dot_dimension_numbers<[1], [1], [0], [0], [0, 0, 1, 0], [], []>} : vector<8x8xbf16>, vector<8x8xbf16>, vector<8x8xf32> -> vector<8x8xf32>
    %79 = arith.addf %78, %46 : vector<8x8xf32>
    %cst_17 = arith.constant dense<0xFF800000> : vector<8xf32>
    %80 = vector.multi_reduction <maximumf>, %79, %cst_17 [1] : vector<8x8xf32> to vector<8xf32>
    %81 = vector.shape_cast %80 : vector<8xf32> to vector<8x1xf32>
    %82 = vector.broadcast %81 : vector<8x1xf32> to vector<8x8xf32>
    %83 = arith.subf %79, %82 : vector<8x8xf32>
    %84 = math.exp %83 : vector<8x8xf32>
    %cst_18 = arith.constant dense<0.000000e+00> : vector<8xf32>
    %85 = vector.multi_reduction <add>, %84, %cst_18 [1] : vector<8x8xf32> to vector<8xf32>
    %86 = vector.shape_cast %85 : vector<8xf32> to vector<8x1xf32>
    %87 = tpu.reciprocal %86 {approx = true} : vector<8x1xf32> -> vector<8x1xf32>
    %88 = vector.broadcast %87 : vector<8x1xf32> to vector<8x8xf32>
    %89 = arith.mulf %84, %88 : vector<8x8xf32>
    %90 = arith.truncf %89 : vector<8x8xf32> to vector<8x8xbf16>
    %91 = vector.extract_strided_slice %40 {offsets = [0, 0], sizes = [8, 8], strides = [1, 1]} : vector<16x16xbf16> to vector<8x8xbf16>
    %cst_19 = arith.constant dense<0.000000e+00> : vector<8x8xf32>
    %92 = tpu.matmul %90, %91, %cst_19 {dimension_numbers = #tpu.dot_dimension_numbers<[1], [0], [0], [1], [0, 0, 1, 1], [], []>} : vector<8x8xbf16>, vector<8x8xbf16>, vector<8x8xf32> -> vector<8x8xf32>
    %93 = vector.extract_strided_slice %30 {offsets = [0, 8], sizes = [8, 4], strides = [1, 1]} : vector<16x16xf32> to vector<8x4xf32>
    %94 = vector.extract_strided_slice %33 {offsets = [0, 8], sizes = [8, 4], strides = [1, 1]} : vector<16x16xf32> to vector<8x4xf32>
    %95 = tpu.concatenate %93, %94 in 1 : vector<8x4xf32>, vector<8x4xf32> -> vector<8x8xf32>
    %96 = arith.truncf %95 : vector<8x8xf32> to vector<8x8xbf16>
    %cst_20 = arith.constant dense<0.000000e+00> : vector<8x8xf32>
    %97 = tpu.matmul %96, %54, %cst_20 {dimension_numbers = #tpu.dot_dimension_numbers<[1], [1], [0], [0], [0, 0, 1, 0], [], []>} : vector<8x8xbf16>, vector<8x8xbf16>, vector<8x8xf32> -> vector<8x8xf32>
    %98 = arith.addf %97, %46 : vector<8x8xf32>
    %cst_21 = arith.constant dense<0xFF800000> : vector<8xf32>
    %99 = vector.multi_reduction <maximumf>, %98, %cst_21 [1] : vector<8x8xf32> to vector<8xf32>
    %100 = vector.shape_cast %99 : vector<8xf32> to vector<8x1xf32>
    %101 = vector.broadcast %100 : vector<8x1xf32> to vector<8x8xf32>
    %102 = arith.subf %98, %101 : vector<8x8xf32>
    %103 = math.exp %102 : vector<8x8xf32>
    %cst_22 = arith.constant dense<0.000000e+00> : vector<8xf32>
    %104 = vector.multi_reduction <add>, %103, %cst_22 [1] : vector<8x8xf32> to vector<8xf32>
    %105 = vector.shape_cast %104 : vector<8xf32> to vector<8x1xf32>
    %106 = tpu.reciprocal %105 {approx = true} : vector<8x1xf32> -> vector<8x1xf32>
    %107 = vector.broadcast %106 : vector<8x1xf32> to vector<8x8xf32>
    %108 = arith.mulf %103, %107 : vector<8x8xf32>
    %109 = arith.truncf %108 : vector<8x8xf32> to vector<8x8xbf16>
    %110 = vector.extract_strided_slice %40 {offsets = [0, 8], sizes = [8, 8], strides = [1, 1]} : vector<16x16xbf16> to vector<8x8xbf16>
    %cst_23 = arith.constant dense<0.000000e+00> : vector<8x8xf32>
    %111 = tpu.matmul %109, %110, %cst_23 {dimension_numbers = #tpu.dot_dimension_numbers<[1], [0], [0], [1], [0, 0, 1, 1], [], []>} : vector<8x8xbf16>, vector<8x8xbf16>, vector<8x8xf32> -> vector<8x8xf32>
    %112 = vector.extract_strided_slice %30 {offsets = [0, 12], sizes = [8, 4], strides = [1, 1]} : vector<16x16xf32> to vector<8x4xf32>
    %113 = vector.extract_strided_slice %33 {offsets = [0, 12], sizes = [8, 4], strides = [1, 1]} : vector<16x16xf32> to vector<8x4xf32>
    %114 = tpu.concatenate %112, %113 in 1 : vector<8x4xf32>, vector<8x4xf32> -> vector<8x8xf32>
    %115 = arith.truncf %114 : vector<8x8xf32> to vector<8x8xbf16>
    %cst_24 = arith.constant dense<0.000000e+00> : vector<8x8xf32>
    %116 = tpu.matmul %115, %54, %cst_24 {dimension_numbers = #tpu.dot_dimension_numbers<[1], [1], [0], [0], [0, 0, 1, 0], [], []>} : vector<8x8xbf16>, vector<8x8xbf16>, vector<8x8xf32> -> vector<8x8xf32>
    %117 = arith.addf %116, %46 : vector<8x8xf32>
    %cst_25 = arith.constant dense<0xFF800000> : vector<8xf32>
    %118 = vector.multi_reduction <maximumf>, %117, %cst_25 [1] : vector<8x8xf32> to vector<8xf32>
    %119 = vector.shape_cast %118 : vector<8xf32> to vector<8x1xf32>
    %120 = vector.broadcast %119 : vector<8x1xf32> to vector<8x8xf32>
    %121 = arith.subf %117, %120 : vector<8x8xf32>
    %122 = math.exp %121 : vector<8x8xf32>
    %cst_26 = arith.constant dense<0.000000e+00> : vector<8xf32>
    %123 = vector.multi_reduction <add>, %122, %cst_26 [1] : vector<8x8xf32> to vector<8xf32>
    %124 = vector.shape_cast %123 : vector<8xf32> to vector<8x1xf32>
    %125 = tpu.reciprocal %124 {approx = true} : vector<8x1xf32> -> vector<8x1xf32>
    %126 = vector.broadcast %125 : vector<8x1xf32> to vector<8x8xf32>
    %127 = arith.mulf %122, %126 : vector<8x8xf32>
    %128 = arith.truncf %127 : vector<8x8xf32> to vector<8x8xbf16>
    %129 = vector.extract_strided_slice %40 {offsets = [0, 8], sizes = [8, 8], strides = [1, 1]} : vector<16x16xbf16> to vector<8x8xbf16>
    %cst_27 = arith.constant dense<0.000000e+00> : vector<8x8xf32>
    %130 = tpu.matmul %128, %129, %cst_27 {dimension_numbers = #tpu.dot_dimension_numbers<[1], [0], [0], [1], [0, 0, 1, 1], [], []>} : vector<8x8xbf16>, vector<8x8xbf16>, vector<8x8xf32> -> vector<8x8xf32>
    %131 = tpu.concatenate %73, %92, %111, %130 in 1 : vector<8x8xf32>, vector<8x8xf32>, vector<8x8xf32>, vector<8x8xf32> -> vector<8x32xf32>
    %132 = vector.extract_strided_slice %36 {offsets = [8, 0], sizes = [8, 4], strides = [1, 1]} : vector<16x8xf32> to vector<8x4xf32>
    %133 = vector.extract_strided_slice %39 {offsets = [8, 0], sizes = [8, 4], strides = [1, 1]} : vector<16x8xf32> to vector<8x4xf32>
    %134 = tpu.concatenate %132, %133 in 1 : vector<8x4xf32>, vector<8x4xf32> -> vector<8x8xf32>
    %135 = arith.truncf %134 : vector<8x8xf32> to vector<8x8xbf16>
    %136 = vector.extract_strided_slice %36 {offsets = [8, 4], sizes = [8, 4], strides = [1, 1]} : vector<16x8xf32> to vector<8x4xf32>
    %137 = vector.extract_strided_slice %39 {offsets = [8, 4], sizes = [8, 4], strides = [1, 1]} : vector<16x8xf32> to vector<8x4xf32>
    %138 = tpu.concatenate %136, %137 in 1 : vector<8x4xf32>, vector<8x4xf32> -> vector<8x8xf32>
    %139 = arith.truncf %138 : vector<8x8xf32> to vector<8x8xbf16>
    %140 = vector.extract_strided_slice %30 {offsets = [8, 0], sizes = [8, 4], strides = [1, 1]} : vector<16x16xf32> to vector<8x4xf32>
    %141 = vector.extract_strided_slice %33 {offsets = [8, 0], sizes = [8, 4], strides = [1, 1]} : vector<16x16xf32> to vector<8x4xf32>
    %142 = tpu.concatenate %140, %141 in 1 : vector<8x4xf32>, vector<8x4xf32> -> vector<8x8xf32>
    %143 = arith.truncf %142 : vector<8x8xf32> to vector<8x8xbf16>
    %cst_28 = arith.constant dense<0.000000e+00> : vector<8x8xf32>
    %144 = tpu.matmul %143, %135, %cst_28 {dimension_numbers = #tpu.dot_dimension_numbers<[1], [1], [0], [0], [0, 0, 1, 0], [], []>} : vector<8x8xbf16>, vector<8x8xbf16>, vector<8x8xf32> -> vector<8x8xf32>
    %145 = arith.addf %144, %46 : vector<8x8xf32>
    %cst_29 = arith.constant dense<0xFF800000> : vector<8xf32>
    %146 = vector.multi_reduction <maximumf>, %145, %cst_29 [1] : vector<8x8xf32> to vector<8xf32>
    %147 = vector.shape_cast %146 : vector<8xf32> to vector<8x1xf32>
    %148 = vector.broadcast %147 : vector<8x1xf32> to vector<8x8xf32>
    %149 = arith.subf %145, %148 : vector<8x8xf32>
    %150 = math.exp %149 : vector<8x8xf32>
    %cst_30 = arith.constant dense<0.000000e+00> : vector<8xf32>
    %151 = vector.multi_reduction <add>, %150, %cst_30 [1] : vector<8x8xf32> to vector<8xf32>
    %152 = vector.shape_cast %151 : vector<8xf32> to vector<8x1xf32>
    %153 = tpu.reciprocal %152 {approx = true} : vector<8x1xf32> -> vector<8x1xf32>
    %154 = vector.broadcast %153 : vector<8x1xf32> to vector<8x8xf32>
    %155 = arith.mulf %150, %154 : vector<8x8xf32>
    %156 = arith.truncf %155 : vector<8x8xf32> to vector<8x8xbf16>
    %157 = vector.extract_strided_slice %40 {offsets = [8, 0], sizes = [8, 8], strides = [1, 1]} : vector<16x16xbf16> to vector<8x8xbf16>
    %cst_31 = arith.constant dense<0.000000e+00> : vector<8x8xf32>
    %158 = tpu.matmul %156, %157, %cst_31 {dimension_numbers = #tpu.dot_dimension_numbers<[1], [0], [0], [1], [0, 0, 1, 1], [], []>} : vector<8x8xbf16>, vector<8x8xbf16>, vector<8x8xf32> -> vector<8x8xf32>
    %159 = vector.extract_strided_slice %30 {offsets = [8, 4], sizes = [8, 4], strides = [1, 1]} : vector<16x16xf32> to vector<8x4xf32>
    %160 = vector.extract_strided_slice %33 {offsets = [8, 4], sizes = [8, 4], strides = [1, 1]} : vector<16x16xf32> to vector<8x4xf32>
    %161 = tpu.concatenate %159, %160 in 1 : vector<8x4xf32>, vector<8x4xf32> -> vector<8x8xf32>
    %162 = arith.truncf %161 : vector<8x8xf32> to vector<8x8xbf16>
    %cst_32 = arith.constant dense<0.000000e+00> : vector<8x8xf32>
    %163 = tpu.matmul %162, %135, %cst_32 {dimension_numbers = #tpu.dot_dimension_numbers<[1], [1], [0], [0], [0, 0, 1, 0], [], []>} : vector<8x8xbf16>, vector<8x8xbf16>, vector<8x8xf32> -> vector<8x8xf32>
    %164 = arith.addf %163, %46 : vector<8x8xf32>
    %cst_33 = arith.constant dense<0xFF800000> : vector<8xf32>
    %165 = vector.multi_reduction <maximumf>, %164, %cst_33 [1] : vector<8x8xf32> to vector<8xf32>
    %166 = vector.shape_cast %165 : vector<8xf32> to vector<8x1xf32>
    %167 = vector.broadcast %166 : vector<8x1xf32> to vector<8x8xf32>
    %168 = arith.subf %164, %167 : vector<8x8xf32>
    %169 = math.exp %168 : vector<8x8xf32>
    %cst_34 = arith.constant dense<0.000000e+00> : vector<8xf32>
    %170 = vector.multi_reduction <add>, %169, %cst_34 [1] : vector<8x8xf32> to vector<8xf32>
    %171 = vector.shape_cast %170 : vector<8xf32> to vector<8x1xf32>
    %172 = tpu.reciprocal %171 {approx = true} : vector<8x1xf32> -> vector<8x1xf32>
    %173 = vector.broadcast %172 : vector<8x1xf32> to vector<8x8xf32>
    %174 = arith.mulf %169, %173 : vector<8x8xf32>
    %175 = arith.truncf %174 : vector<8x8xf32> to vector<8x8xbf16>
    %176 = vector.extract_strided_slice %40 {offsets = [8, 0], sizes = [8, 8], strides = [1, 1]} : vector<16x16xbf16> to vector<8x8xbf16>
    %cst_35 = arith.constant dense<0.000000e+00> : vector<8x8xf32>
    %177 = tpu.matmul %175, %176, %cst_35 {dimension_numbers = #tpu.dot_dimension_numbers<[1], [0], [0], [1], [0, 0, 1, 1], [], []>} : vector<8x8xbf16>, vector<8x8xbf16>, vector<8x8xf32> -> vector<8x8xf32>
    %178 = vector.extract_strided_slice %30 {offsets = [8, 8], sizes = [8, 4], strides = [1, 1]} : vector<16x16xf32> to vector<8x4xf32>
    %179 = vector.extract_strided_slice %33 {offsets = [8, 8], sizes = [8, 4], strides = [1, 1]} : vector<16x16xf32> to vector<8x4xf32>
    %180 = tpu.concatenate %178, %179 in 1 : vector<8x4xf32>, vector<8x4xf32> -> vector<8x8xf32>
    %181 = arith.truncf %180 : vector<8x8xf32> to vector<8x8xbf16>
    %cst_36 = arith.constant dense<0.000000e+00> : vector<8x8xf32>
    %182 = tpu.matmul %181, %139, %cst_36 {dimension_numbers = #tpu.dot_dimension_numbers<[1], [1], [0], [0], [0, 0, 1, 0], [], []>} : vector<8x8xbf16>, vector<8x8xbf16>, vector<8x8xf32> -> vector<8x8xf32>
    %183 = arith.addf %182, %46 : vector<8x8xf32>
    %cst_37 = arith.constant dense<0xFF800000> : vector<8xf32>
    %184 = vector.multi_reduction <maximumf>, %183, %cst_37 [1] : vector<8x8xf32> to vector<8xf32>
    %185 = vector.shape_cast %184 : vector<8xf32> to vector<8x1xf32>
    %186 = vector.broadcast %185 : vector<8x1xf32> to vector<8x8xf32>
    %187 = arith.subf %183, %186 : vector<8x8xf32>
    %188 = math.exp %187 : vector<8x8xf32>
    %cst_38 = arith.constant dense<0.000000e+00> : vector<8xf32>
    %189 = vector.multi_reduction <add>, %188, %cst_38 [1] : vector<8x8xf32> to vector<8xf32>
    %190 = vector.shape_cast %189 : vector<8xf32> to vector<8x1xf32>
    %191 = tpu.reciprocal %190 {approx = true} : vector<8x1xf32> -> vector<8x1xf32>
    %192 = vector.broadcast %191 : vector<8x1xf32> to vector<8x8xf32>
    %193 = arith.mulf %188, %192 : vector<8x8xf32>
    %194 = arith.truncf %193 : vector<8x8xf32> to vector<8x8xbf16>
    %195 = vector.extract_strided_slice %40 {offsets = [8, 8], sizes = [8, 8], strides = [1, 1]} : vector<16x16xbf16> to vector<8x8xbf16>
    %cst_39 = arith.constant dense<0.000000e+00> : vector<8x8xf32>
    %196 = tpu.matmul %194, %195, %cst_39 {dimension_numbers = #tpu.dot_dimension_numbers<[1], [0], [0], [1], [0, 0, 1, 1], [], []>} : vector<8x8xbf16>, vector<8x8xbf16>, vector<8x8xf32> -> vector<8x8xf32>
    %197 = vector.extract_strided_slice %30 {offsets = [8, 12], sizes = [8, 4], strides = [1, 1]} : vector<16x16xf32> to vector<8x4xf32>
    %198 = vector.extract_strided_slice %33 {offsets = [8, 12], sizes = [8, 4], strides = [1, 1]} : vector<16x16xf32> to vector<8x4xf32>
    %199 = tpu.concatenate %197, %198 in 1 : vector<8x4xf32>, vector<8x4xf32> -> vector<8x8xf32>
    %200 = arith.truncf %199 : vector<8x8xf32> to vector<8x8xbf16>
    %cst_40 = arith.constant dense<0.000000e+00> : vector<8x8xf32>
    %201 = tpu.matmul %200, %139, %cst_40 {dimension_numbers = #tpu.dot_dimension_numbers<[1], [1], [0], [0], [0, 0, 1, 0], [], []>} : vector<8x8xbf16>, vector<8x8xbf16>, vector<8x8xf32> -> vector<8x8xf32>
    %202 = arith.addf %201, %46 : vector<8x8xf32>
    %cst_41 = arith.constant dense<0xFF800000> : vector<8xf32>
    %203 = vector.multi_reduction <maximumf>, %202, %cst_41 [1] : vector<8x8xf32> to vector<8xf32>
    %204 = vector.shape_cast %203 : vector<8xf32> to vector<8x1xf32>
    %205 = vector.broadcast %204 : vector<8x1xf32> to vector<8x8xf32>
    %206 = arith.subf %202, %205 : vector<8x8xf32>
    %207 = math.exp %206 : vector<8x8xf32>
    %cst_42 = arith.constant dense<0.000000e+00> : vector<8xf32>
    %208 = vector.multi_reduction <add>, %207, %cst_42 [1] : vector<8x8xf32> to vector<8xf32>
    %209 = vector.shape_cast %208 : vector<8xf32> to vector<8x1xf32>
    %210 = tpu.reciprocal %209 {approx = true} : vector<8x1xf32> -> vector<8x1xf32>
    %211 = vector.broadcast %210 : vector<8x1xf32> to vector<8x8xf32>
    %212 = arith.mulf %207, %211 : vector<8x8xf32>
    %213 = arith.truncf %212 : vector<8x8xf32> to vector<8x8xbf16>
    %214 = vector.extract_strided_slice %40 {offsets = [8, 8], sizes = [8, 8], strides = [1, 1]} : vector<16x16xbf16> to vector<8x8xbf16>
    %cst_43 = arith.constant dense<0.000000e+00> : vector<8x8xf32>
    %215 = tpu.matmul %213, %214, %cst_43 {dimension_numbers = #tpu.dot_dimension_numbers<[1], [0], [0], [1], [0, 0, 1, 1], [], []>} : vector<8x8xbf16>, vector<8x8xbf16>, vector<8x8xf32> -> vector<8x8xf32>
    %216 = tpu.concatenate %158, %177, %196, %215 in 1 : vector<8x8xf32>, vector<8x8xf32>, vector<8x8xf32>, vector<8x8xf32> -> vector<8x32xf32>
    %217 = tpu.concatenate %131, %216 in 0 : vector<8x32xf32>, vector<8x32xf32> -> vector<16x32xf32>
    %218 = arith.truncf %217 : vector<16x32xf32> to vector<16x32xbf16>
    %c0_44 = arith.constant 0 : index
    %c0_45 = arith.constant 0 : index
    %219 = vector.load %arg5[%c0_44, %c0_45] : memref<32x32xbf16, #tpu.memory_space<vmem>>, vector<32x32xbf16>
    %cst_46 = arith.constant dense<0.000000e+00> : vector<16x32xf32>
    %220 = tpu.matmul %218, %219, %cst_46 {dimension_numbers = #tpu.dot_dimension_numbers<[1], [0], [0], [1], [0, 0, 1, 1], [], []>} : vector<16x32xbf16>, vector<32x32xbf16>, vector<16x32xf32> -> vector<16x32xf32>
    %221 = arith.addf %0, %220 : vector<16x32xf32>
    %222 = vector.extract_strided_slice %2 {offsets = [1, 0], sizes = [1, 32], strides = [1, 1]} : vector<2x32xf32> to vector<1x32xf32>
    %223 = arith.mulf %221, %221 : vector<16x32xf32>
    %cst_47 = arith.constant dense<0.000000e+00> : vector<16xf32>
    %224 = vector.multi_reduction <add>, %223, %cst_47 [1] : vector<16x32xf32> to vector<16xf32>
    %225 = vector.shape_cast %224 : vector<16xf32> to vector<16x1xf32>
    %cst_48 = arith.constant 3.200000e+01 : f32
    %226 = vector.broadcast %cst_48 : f32 to vector<16x1xf32>
    %227 = arith.divf %225, %226 : vector<16x1xf32>
    %cst_49 = arith.constant 9.99999997E-7 : f32
    %228 = vector.broadcast %cst_49 : f32 to vector<16x1xf32>
    %229 = arith.addf %227, %228 : vector<16x1xf32>
    %230 = math.rsqrt %229 : vector<16x1xf32>
    %231 = vector.broadcast %230 : vector<16x1xf32> to vector<16x32xf32>
    %232 = arith.mulf %221, %231 : vector<16x32xf32>
    %233 = vector.broadcast %222 : vector<1x32xf32> to vector<16x32xf32>
    %234 = arith.mulf %232, %233 : vector<16x32xf32>
    %235 = arith.truncf %234 : vector<16x32xf32> to vector<16x32xbf16>
    %c0_50 = arith.constant 0 : index
    %c0_51 = arith.constant 0 : index
    %236 = vector.load %arg6[%c0_50, %c0_51] : memref<32x128xbf16, #tpu.memory_space<vmem>>, vector<32x128xbf16>
    %cst_52 = arith.constant dense<0.000000e+00> : vector<16x128xf32>
    %237 = tpu.matmul %235, %236, %cst_52 {dimension_numbers = #tpu.dot_dimension_numbers<[1], [0], [0], [1], [0, 0, 1, 1], [], []>} : vector<16x32xbf16>, vector<32x128xbf16>, vector<16x128xf32> -> vector<16x128xf32>
    %238 = vector.extract_strided_slice %237 {offsets = [0, 0], sizes = [16, 64], strides = [1, 1]} : vector<16x128xf32> to vector<16x64xf32>
    %239 = vector.extract_strided_slice %237 {offsets = [0, 64], sizes = [16, 64], strides = [1, 1]} : vector<16x128xf32> to vector<16x64xf32>
    %cst_53 = arith.constant 0.000000e+00 : f32
    %240 = vector.broadcast %cst_53 : f32 to vector<16x64xf32>
    %241 = arith.subf %240, %238 : vector<16x64xf32>
    %242 = math.exp %241 : vector<16x64xf32>
    %cst_54 = arith.constant 1.000000e+00 : f32
    %243 = vector.broadcast %cst_54 : f32 to vector<16x64xf32>
    %244 = arith.addf %243, %242 : vector<16x64xf32>
    %245 = tpu.reciprocal %244 {approx = true} : vector<16x64xf32> -> vector<16x64xf32>
    %246 = arith.mulf %238, %245 : vector<16x64xf32>
    %247 = arith.mulf %246, %239 : vector<16x64xf32>
    %248 = arith.truncf %247 : vector<16x64xf32> to vector<16x64xbf16>
    %c0_55 = arith.constant 0 : index
    %c0_56 = arith.constant 0 : index
    %249 = vector.load %arg7[%c0_55, %c0_56] : memref<64x32xbf16, #tpu.memory_space<vmem>>, vector<64x32xbf16>
    %cst_57 = arith.constant dense<0.000000e+00> : vector<16x32xf32>
    %250 = tpu.matmul %248, %249, %cst_57 {dimension_numbers = #tpu.dot_dimension_numbers<[1], [0], [0], [1], [0, 0, 1, 1], [], []>} : vector<16x64xbf16>, vector<64x32xbf16>, vector<16x32xf32> -> vector<16x32xf32>
    %251 = arith.addf %221, %250 : vector<16x32xf32>
    %c0_58 = arith.constant 0 : index
    %c0_59 = arith.constant 0 : index
    %252 = vector.load %arg8[%c0_58, %c0_59] : memref<16x32xf32, #tpu.memory_space<vmem>>, vector<16x32xf32>
    tpu.vector_store %arg8[%c0_58, %c0_59], %251 {strides = array<i32>} : memref<16x32xf32, #tpu.memory_space<vmem>>, vector<16x32xf32>,
    return
  }
  func.func @transform_0(%arg0: i32) -> (i32, i32) {
    %c0_i32 = arith.constant 0 : i32
    %c0_i32_0 = arith.constant 0 : i32
    return %arg0, %c0_i32 : i32, i32
  }
  func.func @transform_1(%arg0: i32) -> (i32, i32) {
    %c0_i32 = arith.constant 0 : i32
    %c0_i32_0 = arith.constant 0 : i32
    return %arg0, %c0_i32 : i32, i32
  }
  func.func @transform_2(%arg0: i32) -> (i32, i32) {
    %c0_i32 = arith.constant 0 : i32
    %c0_i32_0 = arith.constant 0 : i32
    %c0_i32_1 = arith.constant 0 : i32
    return %c0_i32, %c0_i32_0 : i32, i32
  }
  func.func @transform_3(%arg0: i32) -> (i32, i32) {
    %c0_i32 = arith.constant 0 : i32
    %c0_i32_0 = arith.constant 0 : i32
    %c0_i32_1 = arith.constant 0 : i32
    return %c0_i32, %c0_i32_0 : i32, i32
  }
  func.func @transform_4(%arg0: i32) -> (i32, i32) {
    %c0_i32 = arith.constant 0 : i32
    %c0_i32_0 = arith.constant 0 : i32
    %c0_i32_1 = arith.constant 0 : i32
    return %c0_i32, %c0_i32_0 : i32, i32
  }
  func.func @transform_5(%arg0: i32) -> (i32, i32) {
    %c0_i32 = arith.constant 0 : i32
    %c0_i32_0 = arith.constant 0 : i32
    %c0_i32_1 = arith.constant 0 : i32
    return %c0_i32, %c0_i32_0 : i32, i32
  }
  func.func @transform_6(%arg0: i32) -> (i32, i32) {
    %c0_i32 = arith.constant 0 : i32
    %c0_i32_0 = arith.constant 0 : i32
    %c0_i32_1 = arith.constant 0 : i32
    return %c0_i32, %c0_i32_0 : i32, i32
  }
  func.func @transform_7(%arg0: i32) -> (i32, i32) {
    %c0_i32 = arith.constant 0 : i32
    %c0_i32_0 = arith.constant 0 : i32
    return %arg0, %c0_i32 : i32, i32
  }
}

</mosaic_0001>

<bundles_post_ra>
// kernel: decoder_layer_forward.1
= control target key start
LH: loop header
LB: loop body
LE: loop exit
PB: predicated region body
PF: predicated region fallthrough
CT: control target
= control target key end

     0   :  { %vm35_vm0 = vcmask 261120   ;;  %s2108_s0 = inlined_call_operand.vmem [shape: f32[16,32], index: 0, kind: input, shape index: {}]   ;;  %s2109_s1 = inlined_call_operand.vmem [shape: f32[16,48], index: 1, kind: input, shape index: {}]   ;;  %s2110_s2 = inlined_call_operand.vmem [shape: f32[2,32], index: 2, kind: input, shape index: {}]   ;;  %s2111_s3 = inlined_call_operand.vmem [shape: bf16[32,64], index: 3, kind: input, shape index: {}]   ;;  %s2112_s4 = inlined_call_operand.vmem [shape: bf16[32,32], index: 4, kind: input, shape index: {}]   ;;  %s2113_s5 = inlined_call_operand.vmem [shape: bf16[32,128], index: 5, kind: input, shape index: {}]   ;;  %s2114_s6 = inlined_call_operand.vmem [shape: bf16[64,32], index: 6, kind: input, shape index: {}]   ;;  %s2115_s7 = inlined_call_operand.hbm [shape: f32[16,32], index: 7, kind: output, shape index: {}]  }
   0x1   :  { %v1804_v0 = vld [vmem:[%s2108_s0] sm:$0xff]  ;;  %v1809_v1 = vld [vmem:[%s2108_s0 + $0x8] sm:$0xff] }
   0x2   :  { %v33_v2 = vmul.f32 %v1804_v0, %v1804_v0  ;;  %v34_v3 = vmul.f32 %v1809_v1, %v1809_v1 }
   0x4   :  { %v36_v4 = vsel %vm35_vm0, %v33_v2, 0.0  ;;  %v39_v5 = vsel %vm35_vm0, %v34_v3, 0.0 }
   0x5   :  { %37 = vadd.xlane.f32.xlu0 %v36_v4 }
   0x6   :  { %12 = vsyncpa [#allocation3], 0  ;;  %v1659_v6 = vld [vmem:[%s2111_s3] sm:$0xff]   ;;  %v1741_v7 = vmov 0.0   ;;  %vm1742_vm1 = vmmov 0   ;;  %v1660_v8 = vld [vmem:[%s2111_s3 + $0x8] sm:$0xff]   ;;  %v51_v16 = vlaneseq }
   0x7   :  { %1492 = vmatprep.subr.bf16.mxu0 %v1741_v7  ;;  %1496 = vmatprep.mubr.msk.bf16.mxu0 %vm1742_vm1, %v1741_v7  ;;  %v30_v9 = vld [vmem:[%s2109_s1] sm:$0xff]  ;;  %v31_v10 = vld [vmem:[%s2109_s1 + $0x8] sm:$0xff]  ;;  %s1743_s12 = smov 120   ;;  %s1744_s3 = smov 112   ;;  %vm207_vm2 = vcmask 31744   ;;  %vm224_vm3 = vcmask 64512  }
   0x8   :  { %1493 = vmatpush3.bf16.msra.mxu0 %v1659_v6  ;;  %1500 = vmatprep.subr.bf16.mxu1 %v1741_v7  ;;  %s1745_s13 = smov 8   ;;  %v1843_v18 = vshrl.u32 %v51_v16, 7  ;;  %v1849_v21 = vld [vmem:[%s2110_s2] sm:$0x3]  ;;  %s1746_s2 = smov 16   ;;  %vm289_vm5 = vcmask 1043456  }
   0x9   :  { %40 = vadd.xlane.f32.xlu0 %v39_v5  ;;  %1494 = vmatprep.subr.bf16.mxu0 %v1741_v7  ;;  %s1747_s15 = smov 96   ;;  %s1748_s16 = smov 92   ;;  %vm673_vm6 = vcmask 130048   ;;  %vm675_vm7 = vcmask 195584   ;;  %vm1351_vm8 = vcmask 523264  }
   0xa   :  { %1502 = vmatprep.mubr.msk.bf16.mxu1 %vm1742_vm1, %v1741_v7  ;;  %174 = vrot.lane.b32.xlu1 %v30_v9, %s1743_s12  ;;  %v53_v19 = vsub.s32 0, %v1843_v18  ;;  %s1749_s17 = smov 116   ;;  %s1750_s18 = smov 124  }
   0xb   :  { %s1751_s19 = smov 88   ;;  %s1752_s20 = smov 108  }
   0xc   :  { %1495 = vmatpush3.bf16.msra.mxu0 %v1660_v8  ;;  %v54_v23 = vrot.slane %v1849_v21, %v53_v19  ;;  %s1753_s21 = smov 104   ;;  %s1755_s22 = smov 80  }
   0xd   :  { %1506 = vmatprep.subr.bf16.mxu0 %v1741_v7  ;;  %s1756_s23 = smov 72   ;;  %s1757_s28 = smov 24  }
   0xe   :  { %140 = vrot.lane.b32.xlu1 %v30_v9, %s1744_s3  ;;  %s1758_s14 = smov 64  }
  0x12   :  { %142 = vrot.lane.b32.xlu1 %v31_v10, %s1744_s3 }
  0x16   :  { %166 = vrot.lane.b32.xlu1 %v30_v9, %s1745_s13 }
  0x1f   :  { %176 = vrot.lane.b32.xlu0 %v31_v10, %s1743_s12 }
  0x7c   :  { %v175_v34 = vpop.permute.xlu1 %174 }
  0x80   :  { %v141_v38 = vpop.permute.xlu1 %140 }
  0x84   :  { %v143_v42 = vpop.permute.xlu1 %142 }
  0x88   :  { %v167_v44 = vpop.permute.xlu1 %166 }
  0x92   :  { %v38_v11 = vpop.xlane.xlu0 %37 }
  0x93   :  { %v43_v12 = vmul.f32 0.03125, %v38_v11 }
  0x95   :  { %v45_v13 = vadd.f32 1e-06, %v43_v12 }
  0x96   :  { %v41_v14 = vpop.xlane.xlu0 %40 }
  0x97   :  { %1669 = vrsqrt.f32 %v45_v13  ;;  %v44_v15 = vmul.f32 0.03125, %v41_v14 }
  0x99   :  { %v46_v17 = vadd.f32 1e-06, %v44_v15 }
  0x9a   :  { %v177_v40 = vpop.permute.xlu0 %176 }
  0x9b   :  { %1671 = vrsqrt.f32 %v46_v17 }
  0xa1   :  { %v1670_v20 = vpop.eup %1669 }
  0xa2   :  { %v49_v22 = vmul.f32 %v1670_v20, %v1804_v0 }
  0xa4   :  { %v55_v26 = vmul.f32 %v54_v23, %v49_v22 }
  0xa5   :  { %v1672_v24 = vpop.eup %1671 }
  0xa6   :  { %v50_v25 = vmul.f32 %v1672_v24, %v1809_v1 }
  0xa8   :  { %v56_v27 = vmul.f32 %v54_v23, %v50_v25 }
  0xaa   :  { %v57_v28 = vpack.c.bf16 %v56_v27, %v55_v26 }
  0xac   :  { %1497 = vmatmul.mubr.msk.bf16.vlgmr.msra.gmra.mrb[0].mxu0 %vm35_vm0, %v57_v28 }
  0xad   :  { %1508 = vmatprep.mubr.msk.bf16.mxu0 %vm1742_vm1, %v1741_v7 }
 0x17f   :  { %v111_v29 = vpop.f32.mrb[0].mxu0 }
 0x180   :  { %v1498_v30 = vpop.f32.mrb[1].mxu0  ;;  %v118_v31 = vmul.f32 %v111_v29, %v30_v9  ;;  %v180_v36 = vmul.f32 %v175_v34, %v111_v29  ;;  %v146_v39 = vmul.f32 %v141_v38, %v111_v29  ;;  %v172_v47 = vmul.f32 %v167_v44, %v111_v29 }
 0x181   :  { %v114_v32 = vpop.f32.mrb[2].mxu0 }
 0x182   :  { %122 = vrot.lane.b32.xlu0 %v118_v31, %s1744_s3  ;;  %158 = vrot.lane.b32.xlu1 %v118_v31, %s1743_s12  ;;  %v1499_v33 = vpop.f32.mrb[3].mxu0  ;;  %v1859_v35 = vpack.c.bf16 %v114_v32, %v111_v29  ;;  %v1861_v37 = vmul.f32 %v114_v32, %v31_v10  ;;  %v181_v41 = vmul.f32 %v177_v40, %v114_v32 }
 0x183   :  { %v147_v43 = vmul.f32 %v143_v42, %v114_v32 }
 0x186   :  { %184 = vrot.lane.b32.xlu1 %v180_v36, %s1745_s13  ;;  %160 = vrot.lane.b32.xlu0 %v1861_v37, %s1743_s12 }
 0x18a   :  { %132 = vrot.lane.b32.xlu1 %v30_v9, %s1746_s2  ;;  %134 = vrot.lane.b32.xlu0 %v31_v10, %s1746_s2 }
 0x18e   :  { %150 = vrot.lane.b32.xlu1 %v146_v39, %s1746_s2  ;;  %124 = vrot.lane.b32.xlu0 %v1861_v37, %s1744_s3 }
 0x192   :  { %168 = vrot.lane.b32.xlu1 %v31_v10, %s1745_s13 }
 0x196   :  { %186 = vrot.lane.b32.xlu1 %v181_v41, %s1745_s13 }
 0x19a   :  { %152 = vrot.lane.b32.xlu1 %v147_v43, %s1746_s2 }
 0x1f4   :  { %v159_v45 = vpop.permute.xlu1 %158  ;;  %v123_v51 = vpop.permute.xlu0 %122 }
 0x1f5   :  { %v164_v46 = vsub.f32 %v118_v31, %v159_v45  ;;  %v128_v54 = vsub.f32 %v118_v31, %v123_v51 }
 0x1f7   :  { %200 = vrot.lane.b32.xlu1 %v164_v46, %s1747_s15 }
 0x1f8   :  { %v185_v48 = vpop.permute.xlu1 %184  ;;  %v161_v57 = vpop.permute.xlu0 %160 }
 0x1f9   :  { %v190_v49 = vadd.f32 %v185_v48, %v172_v47  ;;  %v165_v60 = vsub.f32 %v1861_v37, %v161_v57 }
 0x1fb   :  { %204 = vrot.lane.b32.xlu0 %v190_v49, %s1748_s16 }
 0x1fc   :  { %v133_v50 = vpop.permute.xlu1 %132  ;;  %v135_v59 = vpop.permute.xlu0 %134 }
 0x1fd   :  { %v138_v52 = vmul.f32 %v133_v50, %v111_v29  ;;  %v139_v62 = vmul.f32 %v135_v59, %v114_v32 }
 0x1ff   :  { %210 = vrot.lane.b32.xlu0 %v164_v46, %s1748_s16 }
 0x200   :  { %v151_v53 = vpop.permute.xlu1 %150  ;;  %v125_v4 = vpop.permute.xlu0 %124 }
 0x201   :  { %v156_v55 = vadd.f32 %v151_v53, %v138_v52  ;;  %v129_v5 = vsub.f32 %v1861_v37, %v125_v4 }
 0x203   :  { %219 = vrot.lane.b32.xlu1 %v156_v55, %s1749_s17  ;;  %334 = vrot.lane.b32.xlu0 %v128_v54, %s1750_s18 }
 0x204   :  { %v169_v56 = vpop.permute.xlu1 %168 }
 0x205   :  { %v173_v2 = vmul.f32 %v169_v56, %v114_v32 }
 0x207   :  { %213 = vrot.lane.b32.xlu1 %v190_v49, %s1751_s19  ;;  %440 = vrot.lane.b32.xlu0 %v128_v54, %s1743_s12 }
 0x208   :  { %v187_v58 = vpop.permute.xlu1 %186 }
 0x209   :  { %v191_v3 = vadd.f32 %v187_v58, %v173_v2 }
 0x20b   :  { %337 = vrot.lane.b32.xlu1 %v156_v55, %s1744_s3  ;;  %554 = vrot.lane.b32.xlu0 %v128_v54, %s1749_s17 }
 0x20c   :  { %v153_v61 = vpop.permute.xlu1 %152 }
 0x20d   :  { %v157_v63 = vadd.f32 %v153_v61, %v139_v62  ;;  %v196_v61 = vand.u32 127, %v51_v16  ;;  %v1754_v62 = vmov -3.4028235e+38  }
 0x20f   :  { %443 = vrot.lane.b32.xlu1 %v156_v55, %s1752_s20  ;;  %678 = vrot.lane.b32.xlu0 %v165_v60, %s1747_s15  ;;  %vm197_vm4 = vcmp.le.s32.totalorder %v196_v61, %v1843_v18 }
 0x213   :  { %557 = vrot.lane.b32.xlu1 %v156_v55, %s1753_s21  ;;  %696 = vrot.lane.b32.xlu0 %v157_v63, %s1749_s17 }
 0x217   :  { %682 = vrot.lane.b32.xlu1 %v191_v3, %s1748_s16  ;;  %690 = vrot.lane.b32.xlu0 %v191_v3, %s1751_s19 }
 0x21b   :  { %687 = vrot.lane.b32.xlu1 %v165_v60, %s1748_s16  ;;  %812 = vrot.lane.b32.xlu0 %v157_v63, %s1744_s3 }
 0x21f   :  { %918 = vrot.lane.b32.xlu0 %v157_v63, %s1752_s20  ;;  %809 = vrot.lane.b32.xlu1 %v129_v5, %s1750_s18 }
 0x223   :  { %1032 = vrot.lane.b32.xlu0 %v157_v63, %s1753_s21  ;;  %915 = vrot.lane.b32.xlu1 %v129_v5, %s1743_s12  ;;  %v198_v63 = vsel %vm197_vm4, 0.0, %v1754_v62 }
 0x227   :  { %1029 = vrot.lane.b32.xlu1 %v129_v5, %s1749_s17 }
 0x269   :  { %v201_v6 = vpop.permute.xlu1 %200 }
 0x26d   :  { %v205_v8 = vpop.permute.xlu0 %204 }
 0x26e   :  { %v208_v9 = vsel %vm207_vm2, %v201_v6, %v205_v8 }
 0x26f   :  { %v209_v10 = vpack.c.bf16 %v208_v9, %v208_v9 }
 0x271   :  { %v211_v11 = vpop.permute.xlu0 %210  ;;  %v229_v12 = vsel %vm224_vm3, %v209_v10, 0 }
 0x272   :  { %1501 = vmatpush3.bf16.xpose.msra.mxu1 %v229_v12 }
 0x273   :  { %1512 = vmatprep.subr.bf16.mxu1 %v1741_v7 }
 0x275   :  { %v220_v13 = vpop.permute.xlu1 %219  ;;  %v335_v17 = vpop.permute.xlu0 %334 }
 0x276   :  { %v222_v14 = vsel %vm207_vm2, %v128_v54, %v220_v13 }
 0x277   :  { %v223_v15 = vpack.c.bf16 %v222_v14, %v222_v14 }
 0x279   :  { %v214_v19 = vpop.permute.xlu1 %213  ;;  %1503 = vmatmul.mubr.msk.bf16.vlgmr.msra.gmra.mrb[0].mxu1 %vm224_vm3, %v223_v15  ;;  %v441_v23 = vpop.permute.xlu0 %440 }
 0x27a   :  { %v216_v20 = vsel %vm207_vm2, %v211_v11, %v214_v19  ;;  %1513 = vmatpush3.bf16.xpose.msra.mxu1 %v229_v12  ;;  %1514 = vmatprep.mubr.msk.bf16.mxu1 %vm1742_vm1, %v1741_v7 }
 0x27b   :  { %1524 = vmatprep.subr.bf16.mxu1 %v1741_v7  ;;  %v217_v22 = vpack.c.bf16 %v216_v20, %v216_v20 }
 0x27d   :  { %v338_v24 = vpop.permute.xlu1 %337  ;;  %v452_v28 = vsel %vm224_vm3, %v217_v22, 0  ;;  %v555_v29 = vpop.permute.xlu0 %554 }
 0x27e   :  { %v340_v25 = vsel %vm207_vm2, %v335_v17, %v338_v24 }
 0x27f   :  { %v341_v26 = vpack.c.bf16 %v340_v25, %v340_v25 }
 0x281   :  { %v444_v27 = vpop.permute.xlu1 %443  ;;  %1515 = vmatmul.mubr.msk.bf16.vlgmr.msra.gmra.mrb[4].mxu1 %vm224_vm3, %v341_v26  ;;  %v679_v33 = vpop.permute.xlu0 %678 }
 0x282   :  { %1525 = vmatpush3.bf16.xpose.msra.mxu1 %v452_v28  ;;  %1526 = vmatprep.mubr.msk.bf16.mxu1 %vm1742_vm1, %v1741_v7  ;;  %v446_v30 = vsel %vm207_vm2, %v441_v23, %v444_v27 }
 0x283   :  { %1536 = vmatprep.subr.bf16.mxu1 %v1741_v7  ;;  %v447_v32 = vpack.c.bf16 %v446_v30, %v446_v30 }
 0x285   :  { %v558_v31 = vpop.permute.xlu1 %557  ;;  %v697_v40 = vpop.permute.xlu0 %696 }
 0x286   :  { %v560_v37 = vsel %vm207_vm2, %v555_v29, %v558_v31  ;;  %v699_v43 = vsel %vm207_vm2, %v129_v5, %v697_v40 }
 0x287   :  { %v561_v39 = vpack.c.bf16 %v560_v37, %v560_v37  ;;  %v700_v45 = vpack.c.bf16 %v699_v43, %v699_v43 }
 0x289   :  { %v683_v34 = vpop.permute.xlu1 %682  ;;  %1527 = vmatmul.mubr.msk.bf16.vlgmr.msra.gmra.mrb[8].mxu1 %vm224_vm3, %v447_v32  ;;  %v691_v44 = vpop.permute.xlu0 %690 }
 0x28a   :  { %v685_v36 = vsel %vm207_vm2, %v679_v33, %v683_v34  ;;  %1537 = vmatpush3.bf16.xpose.msra.mxu1 %v452_v28  ;;  %1538 = vmatprep.mubr.msk.bf16.mxu1 %vm1742_vm1, %v1741_v7 }
 0x28b   :  { %1548 = vmatprep.subr.bf16.mxu1 %v1741_v7  ;;  %v686_v38 = vpack.c.bf16 %v685_v36, %v685_v36 }
 0x28d   :  { %v705_v41 = vsel %vm224_vm3, %v686_v38, 0  ;;  %v688_v42 = vpop.permute.xlu1 %687  ;;  %v813_v48 = vpop.permute.xlu0 %812 }
 0x28e   :  { %v693_v47 = vsel %vm207_vm2, %v688_v42, %v691_v44 }
 0x28f   :  { %v694_v50 = vpack.c.bf16 %v693_v47, %v693_v47 }
 0x291   :  { %1539 = vmatmul.mubr.msk.bf16.vlgmr.msra.gmra.mrb[12].mxu1 %vm224_vm3, %v561_v39  ;;  %v810_v46 = vpop.permute.xlu1 %809  ;;  %v927_v53 = vsel %vm224_vm3, %v694_v50, 0  ;;  %v919_v54 = vpop.permute.xlu0 %918 }
 0x292   :  { %1549 = vmatpush3.bf16.xpose.msra.mxu1 %v705_v41  ;;  %1550 = vmatprep.mubr.msk.bf16.mxu1 %vm1742_vm1, %v1741_v7  ;;  %v815_v49 = vsel %vm207_vm2, %v810_v46, %v813_v48 }
 0x293   :  { %1560 = vmatprep.subr.bf16.mxu1 %v1741_v7  ;;  %v816_v51 = vpack.c.bf16 %v815_v49, %v815_v49 }
 0x295   :  { %v916_v52 = vpop.permute.xlu1 %915  ;;  %v1033_v58 = vpop.permute.xlu0 %1032 }
 0x296   :  { %v921_v55 = vsel %vm207_vm2, %v916_v52, %v919_v54 }
 0x297   :  { %v922_v56 = vpack.c.bf16 %v921_v55, %v921_v55 }
 0x299   :  { %1551 = vmatmul.mubr.msk.bf16.vlgmr.msra.gmra.mrb[16].mxu1 %vm224_vm3, %v700_v45  ;;  %v1030_v57 = vpop.permute.xlu1 %1029 }
 0x29a   :  { %1561 = vmatpush3.bf16.xpose.msra.mxu1 %v705_v41  ;;  %1562 = vmatprep.mubr.msk.bf16.mxu1 %vm1742_vm1, %v1741_v7  ;;  %v1035_v59 = vsel %vm207_vm2, %v1030_v57, %v1033_v58 }
 0x29b   :  { %1572 = vmatprep.subr.bf16.mxu1 %v1741_v7  ;;  %v1036_v60 = vpack.c.bf16 %v1035_v59, %v1035_v59 }
 0x2a1   :  { %1563 = vmatmul.mubr.msk.bf16.vlgmr.msra.gmra.mrb[20].mxu1 %vm224_vm3, %v816_v51 }
 0x2a2   :  { %1573 = vmatpush3.bf16.xpose.msra.mxu1 %v927_v53  ;;  %1574 = vmatprep.mubr.msk.bf16.mxu1 %vm1742_vm1, %v1741_v7 }
 0x2a3   :  { %1584 = vmatprep.subr.bf16.mxu1 %v1741_v7 }
 0x2a9   :  { %1575 = vmatmul.mubr.msk.bf16.vlgmr.msra.gmra.mrb[24].mxu1 %vm224_vm3, %v922_v56 }
 0x2aa   :  { %1585 = vmatpush3.bf16.xpose.msra.mxu1 %v927_v53  ;;  %1586 = vmatprep.mubr.msk.bf16.mxu1 %vm1742_vm1, %v1741_v7 }
 0x2ab   :  { %1596 = vmatprep.subr.bf16.mxu1 %v1741_v7 }
 0x2b1   :  { %1587 = vmatmul.mubr.msk.bf16.vlgmr.msra.gmra.mrb[28].mxu1 %vm224_vm3, %v1036_v60 }
 0x2b2   :  { %1600 = vmatprep.mubr.msk.bf16.mxu1 %vm1742_vm1, %v1741_v7 }
 0x34c   :  { %v265_v2 = vpop.f32.mrb[0].mxu1 }
 0x34d   :  { %v266_v3 = vadd.f32 %v265_v2, %v198_v63  ;;  %v1504_v4 = vpop.f32.mrb[1].mxu1 }
 0x34e   :  { %v268_v5 = vpop.f32.mrb[2].mxu1 }
 0x34f   :  { %v1505_v6 = vpop.f32.mrb[3].mxu1  ;;  %v271_v8 = vsel %vm224_vm3, %v266_v3, -inf }
 0x350   :  { %272 = vmax.xlane.f32.xlu1 %v271_v8 }
 0x354   :  { %v379_v9 = vpop.f32.mrb[4].mxu1 }
 0x355   :  { %v380_v10 = vadd.f32 %v379_v9, %v198_v63  ;;  %v1516_v11 = vpop.f32.mrb[5].mxu1 }
 0x356   :  { %v382_v12 = vpop.f32.mrb[6].mxu1 }
 0x357   :  { %v1517_v13 = vpop.f32.mrb[7].mxu1  ;;  %v385_v14 = vsel %vm224_vm3, %v380_v10, -inf }
 0x358   :  { %386 = vmax.xlane.f32.xlu0 %v385_v14 }
 0x35c   :  { %v488_v16 = vpop.f32.mrb[8].mxu1 }
 0x35d   :  { %v489_v15 = vadd.f32 %v488_v16, %v198_v63  ;;  %v1528_v17 = vpop.f32.mrb[9].mxu1 }
 0x35e   :  { %v491_v19 = vpop.f32.mrb[10].mxu1 }
 0x35f   :  { %v1529_v20 = vpop.f32.mrb[11].mxu1  ;;  %v494_v22 = vsel %vm224_vm3, %v489_v15, -inf }
 0x360   :  { %495 = vmax.xlane.f32.xlu0 %v494_v22 }
 0x364   :  { %v599_v23 = vpop.f32.mrb[12].mxu1 }
 0x365   :  { %v600_v24 = vadd.f32 %v599_v23, %v198_v63  ;;  %v1540_v25 = vpop.f32.mrb[13].mxu1 }
 0x366   :  { %v602_v26 = vpop.f32.mrb[14].mxu1 }
 0x367   :  { %v1541_v27 = vpop.f32.mrb[15].mxu1  ;;  %v605_v28 = vsel %vm224_vm3, %v600_v24, -inf }
 0x368   :  { %606 = vmax.xlane.f32.xlu1 %v605_v28 }
 0x36c   :  { %v741_v29 = vpop.f32.mrb[16].mxu1 }
 0x36d   :  { %v1946_v30 = vadd.f32 %v741_v29, %v198_v63  ;;  %v1552_v31 = vpop.f32.mrb[17].mxu1 }
 0x36e   :  { %v744_v32 = vpop.f32.mrb[18].mxu1 }
 0x36f   :  { %v1553_v33 = vpop.f32.mrb[19].mxu1  ;;  %v747_v34 = vsel %vm224_vm3, %v1946_v30, -inf }
 0x370   :  { %748 = vmax.xlane.f32.xlu0 %v747_v34 }
 0x374   :  { %v854_v36 = vpop.f32.mrb[20].mxu1 }
 0x375   :  { %v1950_v37 = vadd.f32 %v854_v36, %v198_v63  ;;  %v1564_v38 = vpop.f32.mrb[21].mxu1  ;;  %v759_v36 = vrot.slane %v1859_v35, 4 }
 0x376   :  { %v857_v39 = vpop.f32.mrb[22].mxu1 }
 0x377   :  { %v1565_v40 = vpop.f32.mrb[23].mxu1  ;;  %v860_v41 = vsel %vm224_vm3, %v1950_v37, -inf }
 0x378   :  { %861 = vmax.xlane.f32.xlu1 %v860_v41 }
 0x37c   :  { %v963_v42 = vpop.f32.mrb[24].mxu1 }
 0x37d   :  { %v964_v43 = vadd.f32 %v963_v42, %v198_v63  ;;  %v1576_v44 = vpop.f32.mrb[25].mxu1 }
 0x37e   :  { %v966_v45 = vpop.f32.mrb[26].mxu1 }
 0x37f   :  { %v1577_v46 = vpop.f32.mrb[27].mxu1  ;;  %v969_v47 = vsel %vm224_vm3, %v964_v43, -inf }
 0x380   :  { %970 = vmax.xlane.f32.xlu0 %v969_v47 }
 0x384   :  { %v1074_v48 = vpop.f32.mrb[28].mxu1 }
 0x385   :  { %v1075_v49 = vadd.f32 %v1074_v48, %v198_v63  ;;  %v1588_v50 = vpop.f32.mrb[29].mxu1 }
 0x386   :  { %v1077_v51 = vpop.f32.mrb[30].mxu1 }
 0x387   :  { %v1589_v52 = vpop.f32.mrb[31].mxu1  ;;  %v1080_v53 = vsel %vm224_vm3, %v1075_v49, -inf }
 0x388   :  { %1081 = vmax.xlane.f32.xlu1 %v1080_v53 }
 0x3dd   :  { %v273_v54 = vpop.xlane.xlu1 %272 }
 0x3de   :  { %v274_v55 = vsub.f32 %v266_v3, %v273_v54 }
 0x3e0   :  { %v275_v56 = vmul.f32 1.442695, %v274_v55 }
 0x3e2   :  { %1673 = vpow2.f32 %v275_v56 }
 0x3e5   :  { %v387_v57 = vpop.xlane.xlu0 %386 }
 0x3e6   :  { %v388_v58 = vsub.f32 %v380_v10, %v387_v57 }
 0x3e8   :  { %v389_v59 = vmul.f32 1.442695, %v388_v58 }
 0x3ea   :  { %1675 = vpow2.f32 %v389_v59 }
 0x3ec   :  { %v1674_v60 = vpop.eup %1673 }
 0x3ed   :  { %v496_v61 = vpop.xlane.xlu0 %495  ;;  %v277_v62 = vsel %vm224_vm3, %v1674_v60, 0.0 }
 0x3ee   :  { %v497_v2 = vsub.f32 %v489_v15, %v496_v61  ;;  %278 = vadd.xlane.f32.xlu0 %v277_v62 }
 0x3f0   :  { %v498_v63 = vmul.f32 1.442695, %v497_v2 }
 0x3f2   :  { %1677 = vpow2.f32 %v498_v63 }
 0x3f4   :  { %v1957_v4 = vpop.eup %1675 }
 0x3f5   :  { %v607_v5 = vpop.xlane.xlu1 %606  ;;  %v391_v3 = vsel %vm224_vm3, %v1957_v4, 0.0 }
 0x3f6   :  { %v608_v6 = vsub.f32 %v600_v24, %v607_v5  ;;  %392 = vadd.xlane.f32.xlu1 %v391_v3 }
 0x3f8   :  { %v609_v8 = vmul.f32 1.442695, %v608_v6 }
 0x3fa   :  { %1679 = vpow2.f32 %v609_v8 }
 0x3fc   :  { %v1961_v9 = vpop.eup %1677 }
 0x3fd   :  { %v500_v10 = vsel %vm224_vm3, %v1961_v9, 0.0  ;;  %v749_v13 = vpop.xlane.xlu0 %748 }
 0x3fe   :  { %501 = vadd.xlane.f32.xlu0 %v500_v10  ;;  %v750_v17 = vsub.f32 %v1946_v30, %v749_v13 }
 0x400   :  { %v751_v20 = vmul.f32 1.442695, %v750_v17 }
 0x404   :  { %v1965_v11 = vpop.eup %1679 }
 0x405   :  { %v611_v12 = vsel %vm224_vm3, %v1965_v11, 0.0  ;;  %v862_v19 = vpop.xlane.xlu1 %861 }
 0x406   :  { %612 = vadd.xlane.f32.xlu1 %v611_v12  ;;  %v863_v22 = vsub.f32 %v1950_v37, %v862_v19 }
 0x408   :  { %v864_v24 = vmul.f32 1.442695, %v863_v22 }
 0x40d   :  { %v971_v14 = vpop.xlane.xlu0 %970 }
 0x40e   :  { %v972_v16 = vsub.f32 %v964_v43, %v971_v14 }
 0x410   :  { %v973_v15 = vmul.f32 1.442695, %v972_v16 }
 0x412   :  { %1681 = vpow2.f32 %v973_v15 }
 0x413   :  { %1683 = vpow2.f32 %v751_v20 }
 0x414   :  { %284 = vrot.lane.b32.xlu0 %v1859_v35, %s1755_s22  ;;  %1685 = vpow2.f32 %v864_v24 }
 0x415   :  { %v1082_v23 = vpop.xlane.xlu1 %1081 }
 0x416   :  { %v1083_v25 = vsub.f32 %v1075_v49, %v1082_v23 }
 0x417   :  { %506 = vrot.lane.b32.xlu1 %v1859_v35, %s1756_s23 }
 0x418   :  { %v1084_v27 = vmul.f32 1.442695, %v1083_v25 }
 0x41a   :  { %1687 = vpow2.f32 %v1084_v27 }
 0x41c   :  { %v1975_v26 = vpop.eup %1681 }
 0x41d   :  { %v975_v28 = vsel %vm224_vm3, %v1975_v26, 0.0  ;;  %v1979_v29 = vpop.eup %1683 }
 0x41e   :  { %v753_v30 = vsel %vm224_vm3, %v1979_v29, 0.0  ;;  %v1983_v31 = vpop.eup %1685 }
 0x41f   :  { %v866_v32 = vsel %vm224_vm3, %v1983_v31, 0.0 }
 0x424   :  { %v1987_v33 = vpop.eup %1687 }
 0x425   :  { %v1086_v34 = vsel %vm224_vm3, %v1987_v33, 0.0 }
 0x433   :  { %976 = vadd.xlane.f32.xlu0 %v975_v28 }
 0x43b   :  { %754 = vadd.xlane.f32.xlu1 %v753_v30 }
 0x43f   :  { %867 = vadd.xlane.f32.xlu1 %v866_v32 }
 0x443   :  { %1087 = vadd.xlane.f32.xlu1 %v1086_v34 }
 0x449   :  { %760 = vrot.lane.b32.xlu0 %v759_v36, %s1755_s22 }
 0x454   :  { %981 = vrot.lane.b32.xlu1 %v759_v36, %s1756_s23 }
 0x47b   :  { %v279_v37 = vpop.xlane.xlu0 %278 }
 0x47c   :  { %1689 = vrcp.f32 %v279_v37 }
 0x483   :  { %v393_v38 = vpop.xlane.xlu1 %392 }
 0x484   :  { %1691 = vrcp.f32 %v393_v38 }
 0x486   :  { %v1690_v39 = vpop.eup %1689 }
 0x487   :  { %v281_v41 = vmul.f32 %v1690_v39, %v1674_v60  ;;  %v1661_v39 = vld [vmem:[%s2112_s4] sm:$0xff]  }
 0x488   :  { %1597 = vmatpush3.bf16.msra.mxu1 %v1661_v39 }
 0x489   :  { %v282_v44 = vpack.c.bf16 %v281_v41, %v281_v41  ;;  %1598 = vmatprep.subr.bf16.mxu1 %v1741_v7 }
 0x48b   :  { %v502_v40 = vpop.xlane.xlu0 %501 }
 0x48c   :  { %1693 = vrcp.f32 %v502_v40 }
 0x48e   :  { %v1692_v35 = vpop.eup %1691 }
 0x48f   :  { %v285_v42 = vpop.permute.xlu0 %284  ;;  %v395_v46 = vmul.f32 %v1692_v35, %v1957_v4 }
 0x490   :  { %v291_v43 = vsel %vm289_vm5, %v285_v42, 0 }
 0x491   :  { %1507 = vmatpush3.bf16.msra.mxu0 %v291_v43  ;;  %v396_v48 = vpack.c.bf16 %v395_v46, %v395_v46 }
 0x492   :  { %1518 = vmatprep.subr.bf16.mxu0 %v1741_v7 }
 0x493   :  { %v613_v45 = vpop.xlane.xlu1 %612 }
 0x494   :  { %1509 = vmatmul.mubr.msk.bf16.vlgmr.msra.gmra.mrb[4].mxu0 %vm224_vm3, %v282_v44  ;;  %1695 = vrcp.f32 %v613_v45  ;;  %v1662_v44 = vld [vmem:[%s2112_s4 + $0x8] sm:$0xff]  }
 0x495   :  { %1519 = vmatpush3.bf16.msra.mxu0 %v291_v43  ;;  %1520 = vmatprep.mubr.msk.bf16.mxu0 %vm1742_vm1, %v1741_v7 }
 0x496   :  { %1530 = vmatprep.subr.bf16.mxu0 %v1741_v7  ;;  %v1694_v49 = vpop.eup %1693  ;;  %1599 = vmatpush3.bf16.msra.mxu1 %v1662_v44 }
 0x497   :  { %v507_v47 = vpop.permute.xlu1 %506  ;;  %v504_v51 = vmul.f32 %v1694_v49, %v1961_v9  ;;  %1612 = vmatprep.subr.bf16.mxu1 %v1741_v7 }
 0x498   :  { %v512_v50 = vsel %vm289_vm5, %v507_v47, 0 }
 0x499   :  { %v505_v52 = vpack.c.bf16 %v504_v51, %v504_v51 }
 0x49c   :  { %1521 = vmatmul.mubr.msk.bf16.vlgmr.msra.gmra.mrb[8].mxu0 %vm224_vm3, %v396_v48 }
 0x49d   :  { %1531 = vmatpush3.bf16.msra.mxu0 %v512_v50  ;;  %1532 = vmatprep.mubr.msk.bf16.mxu0 %vm1742_vm1, %v1741_v7 }
 0x49e   :  { %1542 = vmatprep.subr.bf16.mxu0 %v1741_v7  ;;  %v1696_v53 = vpop.eup %1695 }
 0x49f   :  { %v615_v54 = vmul.f32 %v1696_v53, %v1965_v11 }
 0x4a1   :  { %v616_v55 = vpack.c.bf16 %v615_v54, %v615_v54 }
 0x4a4   :  { %1533 = vmatmul.mubr.msk.bf16.vlgmr.msra.gmra.mrb[12].mxu0 %vm224_vm3, %v505_v52 }
 0x4a5   :  { %1543 = vmatpush3.bf16.msra.mxu0 %v512_v50  ;;  %1544 = vmatprep.mubr.msk.bf16.mxu0 %vm1742_vm1, %v1741_v7 }
 0x4a6   :  { %1554 = vmatprep.subr.bf16.mxu0 %v1741_v7 }
 0x4ac   :  { %1545 = vmatmul.mubr.msk.bf16.vlgmr.msra.gmra.mrb[16].mxu0 %vm224_vm3, %v616_v55 }
 0x4ad   :  { %1556 = vmatprep.mubr.msk.bf16.mxu0 %vm1742_vm1, %v1741_v7 }
 0x4c0   :  { %v977_v56 = vpop.xlane.xlu0 %976 }
 0x4c4   :  { %v761_v57 = vpop.permute.xlu0 %760 }
 0x4c5   :  { %v766_v58 = vsel %vm289_vm5, %v761_v57, 0 }
 0x4c6   :  { %1555 = vmatpush3.bf16.msra.mxu0 %v766_v58 }
 0x4c7   :  { %1566 = vmatprep.subr.bf16.mxu0 %v1741_v7 }
 0x4c8   :  { %v755_v59 = vpop.xlane.xlu1 %754 }
 0x4c9   :  { %1697 = vrcp.f32 %v755_v59 }
 0x4cc   :  { %v868_v60 = vpop.xlane.xlu1 %867 }
 0x4cd   :  { %1699 = vrcp.f32 %v868_v60 }
 0x4ce   :  { %1701 = vrcp.f32 %v977_v56 }
 0x4d0   :  { %v1088_v4 = vpop.xlane.xlu1 %1087 }
 0x4d1   :  { %1703 = vrcp.f32 %v1088_v4 }
 0x4d3   :  { %v1698_v61 = vpop.eup %1697 }
 0x4d4   :  { %v757_v62 = vmul.f32 %v1698_v61, %v1979_v29  ;;  %v982_v3 = vpop.permute.xlu1 %981 }
 0x4d5   :  { %v987_v9 = vsel %vm289_vm5, %v982_v3, 0 }
 0x4d6   :  { %v758_v2 = vpack.c.bf16 %v757_v62, %v757_v62 }
 0x4d7   :  { %v1700_v63 = vpop.eup %1699 }
 0x4d8   :  { %1557 = vmatmul.mubr.msk.bf16.vlgmr.msra.gmra.mrb[20].mxu0 %vm224_vm3, %v758_v2  ;;  %v870_v5 = vmul.f32 %v1700_v63, %v1983_v31  ;;  %v1702_v8 = vpop.eup %1701 }
 0x4d9   :  { %1567 = vmatpush3.bf16.msra.mxu0 %v766_v58  ;;  %1568 = vmatprep.mubr.msk.bf16.mxu0 %vm1742_vm1, %v1741_v7  ;;  %v979_v10 = vmul.f32 %v1702_v8, %v1975_v26 }
 0x4da   :  { %1578 = vmatprep.subr.bf16.mxu0 %v1741_v7  ;;  %v871_v6 = vpack.c.bf16 %v870_v5, %v870_v5 }
 0x4db   :  { %v980_v11 = vpack.c.bf16 %v979_v10, %v979_v10  ;;  %v1704_v12 = vpop.eup %1703 }
 0x4dc   :  { %v1090_v13 = vmul.f32 %v1704_v12, %v1987_v33 }
 0x4de   :  { %v1091_v14 = vpack.c.bf16 %v1090_v13, %v1090_v13 }
 0x4e0   :  { %1569 = vmatmul.mubr.msk.bf16.vlgmr.msra.gmra.mrb[24].mxu0 %vm224_vm3, %v871_v6 }
 0x4e1   :  { %1579 = vmatpush3.bf16.msra.mxu0 %v987_v9  ;;  %1580 = vmatprep.mubr.msk.bf16.mxu0 %vm1742_vm1, %v1741_v7 }
 0x4e2   :  { %1590 = vmatprep.subr.bf16.mxu0 %v1741_v7 }
 0x4e8   :  { %1581 = vmatmul.mubr.msk.bf16.vlgmr.msra.gmra.mrb[28].mxu0 %vm224_vm3, %v980_v11 }
 0x4e9   :  { %1591 = vmatpush3.bf16.msra.mxu0 %v987_v9  ;;  %1592 = vmatprep.mubr.msk.bf16.mxu0 %vm1742_vm1, %v1741_v7 }
 0x4ea   :  { %1604 = vmatprep.subr.bf16.mxu0 %v1741_v7 }
 0x4f0   :  { %1593 = vmatmul.mubr.msk.bf16.vlgmr.msra.gmra.mrb[32].mxu0 %vm224_vm3, %v1091_v14 }
 0x4f1   :  { %1608 = vmatprep.mubr.msk.bf16.mxu0 %vm1742_vm1, %v1741_v7 }
 0x567   :  { %v327_v16 = vpop.f32.mrb[4].mxu0 }
 0x568   :  { %v1510_v15 = vpop.f32.mrb[5].mxu0 }
 0x569   :  { %v330_v17 = vpop.f32.mrb[6].mxu0 }
 0x56a   :  { %v1511_v19 = vpop.f32.mrb[7].mxu0 }
 0x56f   :  { %v434_v20 = vpop.f32.mrb[8].mxu0 }
 0x570   :  { %v1522_v22 = vpop.f32.mrb[9].mxu0 }
 0x571   :  { %v437_v23 = vpop.f32.mrb[10].mxu0 }
 0x572   :  { %v1523_v24 = vpop.f32.mrb[11].mxu0 }
 0x577   :  { %v548_v25 = vpop.f32.mrb[12].mxu0 }
 0x578   :  { %v1534_v26 = vpop.f32.mrb[13].mxu0 }
 0x579   :  { %v551_v27 = vpop.f32.mrb[14].mxu0 }
 0x57a   :  { %v1535_v28 = vpop.f32.mrb[15].mxu0  ;;  %v1231_v27 = vsub.s32 1, %v1843_v18  ;;  %v1666_v18 = vld [vmem:[%s2114_s6 + $0x8] sm:$0xff]  }
 0x57f   :  { %v654_v29 = vpop.f32.mrb[16].mxu0 }
 0x580   :  { %v1546_v30 = vpop.f32.mrb[17].mxu0 }
 0x581   :  { %v657_v31 = vpop.f32.mrb[18].mxu0 }
 0x582   :  { %v1547_v32 = vpop.f32.mrb[19].mxu0 }
 0x5ab   :  { %v802_v33 = vpop.f32.mrb[20].mxu0 }
 0x5ac   :  { %v1558_v34 = vpop.f32.mrb[21].mxu0 }
 0x5ad   :  { %v805_v36 = vpop.f32.mrb[22].mxu0 }
 0x5ae   :  { %v1559_v37 = vpop.f32.mrb[23].mxu0 }
 0x5af   :  { %v1665_v37 = vld [vmem:[%s2114_s6] sm:$0xff]  }
 0x5b3   :  { %v909_v38 = vpop.f32.mrb[24].mxu0 }
 0x5b4   :  { %v1644_v40 = vpack.i.bf16 %v909_v38, %v434_v20  ;;  %v1570_v41 = vpop.f32.mrb[25].mxu0  ;;  %v1668_v38 = vld [vmem:[%s2114_s6 + $0x18] sm:$0xff]  }
 0x5b5   :  { %v912_v42 = vpop.f32.mrb[26].mxu0 }
 0x5b6   :  { %1645 = vrot.lane.b32.xlu0 %v1644_v40, %s1745_s13  ;;  %v1571_v43 = vpop.f32.mrb[27].mxu0 }
 0x5bb   :  { %v1023_v35 = vpop.f32.mrb[28].mxu0 }
 0x5bc   :  { %v1649_v45 = vpack.i.bf16 %v1023_v35, %v548_v25  ;;  %v1582_v46 = vpop.f32.mrb[29].mxu0 }
 0x5bd   :  { %v1026_v47 = vpop.f32.mrb[30].mxu0 }
 0x5be   :  { %1650 = vrot.lane.b32.xlu0 %v1649_v45, %s1746_s2  ;;  %v1583_v48 = vpop.f32.mrb[31].mxu0 }
 0x5c3   :  { %v1129_v49 = vpop.f32.mrb[32].mxu0 }
 0x5c4   :  { %v1654_v50 = vpack.i.bf16 %v1129_v49, %v654_v29  ;;  %v1594_v51 = vpop.f32.mrb[33].mxu0  ;;  %v1232_v29 = vrot.slane %v1849_v21, %v1231_v27  ;;  %v1667_v21 = vld [vmem:[%s2114_s6 + $0x10] sm:$0xff]   ;;  %s1759_s6 = smov [#allocation2]  }
 0x5c5   :  { %v1132_v52 = vpop.f32.mrb[34].mxu0  ;;  %s1405_s2 = sshll.u32 %s1759_s6, 4  ;;  %s1406_s2 = int_to_ptr.vmem [resolvable:$true] %s1405_s2 }
 0x5c6   :  { %1655 = vrot.lane.b32.xlu1 %v1654_v50, %s1757_s28  ;;  %v1595_v53 = vpop.f32.mrb[35].mxu0  ;;  %s1717_s15 = scalar_lea.vmem %s1406_s2, 256  ;;  %p1722_p1 = scmp.lt.s32.totalorder %s1406_s2, %s1406_s2 }
 0x5c7   :  { %p1718_p0 = scmp.ne.s32.totalorder %s1406_s2, %s1717_s15  ;;  %p1723_p2 = scmp.lt.s32.totalorder %s1717_s15, %s1717_s15 }
 0x5c9   :  { %p1724_p3 = por %p1723_p2, %p1722_p1 }
 0x5cb   :  { %p1725_p4 = pnand %p1724_p3, %p1718_p0 }
 0x628   :  { %v1646_v54 = vpop.permute.xlu0 %1645 }
 0x629   :  { %v1648_v56 = vunpack.i.h.bf16 %v1646_v54  ;;  %v1647_v57 = vunpack.i.l.bf16 %v1646_v54 }
 0x62b   :  { %v1147_v61 = vsel %vm224_vm3, %v802_v33, %v1648_v56  ;;  %v672_v62 = vsel %vm224_vm3, %v327_v16, %v1647_v57 }
 0x630   :  { %v1651_v55 = vpop.permute.xlu0 %1650 }
 0x631   :  { %v1653_v58 = vunpack.i.h.bf16 %v1651_v55  ;;  %v1652_v59 = vunpack.i.l.bf16 %v1651_v55 }
 0x633   :  { %v1148_v4 = vsel %vm673_vm6, %v1147_v61, %v1653_v58  ;;  %v674_v5 = vsel %vm673_vm6, %v672_v62, %v1652_v59 }
 0x638   :  { %v1656_v60 = vpop.permute.xlu1 %1655 }
 0x639   :  { %v1658_v2 = vunpack.i.h.bf16 %v1656_v60  ;;  %v1657_v63 = vunpack.i.l.bf16 %v1656_v60 }
 0x63b   :  { %v1149_v3 = vsel %vm675_vm7, %v1148_v4, %v1658_v2  ;;  %v676_v6 = vsel %vm675_vm7, %v674_v5, %v1657_v63 }
 0x63c   :  { %v1150_v8 = vpack.c.bf16 %v1149_v3, %v676_v6 }
 0x63e   :  { %1601 = vmatmul.mubr.msk.bf16.vlgmr.msra.gmra.mrb[32].mxu1 %vm35_vm0, %v1150_v8 }
 0x63f   :  { %1620 = vmatprep.mubr.msk.bf16.mxu1 %vm1742_vm1, %v1741_v7  ;;  %1613 = vmatpush3.bf16.msra.mxu1 %v1665_v37 }
 0x640   :  { %1614 = vmatprep.subr.bf16.mxu1 %v1741_v7 }
 0x643   :  { %1615 = vmatpush3.bf16.msra.mxu1 %v1666_v18 }
 0x644   :  { %1616 = vmatprep.subr.bf16.mxu1 %v1741_v7 }
 0x647   :  { %1617 = vmatpush3.bf16.msra.mxu1 %v1667_v21 }
 0x648   :  { %1618 = vmatprep.subr.bf16.mxu1 %v1741_v7 }
 0x64b   :  { %1619 = vmatpush3.bf16.msra.mxu1 %v1668_v38 }
 0x711   :  { %v1204_v9 = vpop.f32.mrb[32].mxu1 }
 0x712   :  { %v2053_v10 = vadd.f32 %v1204_v9, %v1804_v0  ;;  %v1602_v11 = vpop.f32.mrb[33].mxu1  ;;  %v1663_v0 = vld [vmem:[%s2113_s5] sm:$0xff]  }
 0x713   :  { %v1207_v12 = vpop.f32.mrb[34].mxu1  ;;  %1605 = vmatpush3.bf16.msra.mxu0 %v1663_v0 }
 0x714   :  { %v2056_v13 = vadd.f32 %v1207_v12, %v1809_v1  ;;  %v1603_v14 = vpop.f32.mrb[35].mxu1  ;;  %v1213_v16 = vmul.f32 %v2053_v10, %v2053_v10  ;;  %v1664_v1 = vld [vmem:[%s2113_s5 + $0x8] sm:$0xff]   ;;  %1606 = vmatprep.subr.bf16.mxu0 %v1741_v7 }
 0x716   :  { %v1215_v15 = vsel %vm35_vm0, %v1213_v16, 0.0  ;;  %v1214_v17 = vmul.f32 %v2056_v13, %v2056_v13 }
 0x717   :  { %1216 = vadd.xlane.f32.xlu0 %v1215_v15  ;;  %1607 = vmatpush3.bf16.msra.mxu0 %v1664_v1 }
 0x718   :  { %v1218_v19 = vsel %vm35_vm0, %v1214_v17, 0.0 }
 0x719   :  { %1219 = vadd.xlane.f32.xlu1 %v1218_v19 }
 0x7a4   :  { %v1217_v20 = vpop.xlane.xlu0 %1216 }
 0x7a5   :  { %v1221_v22 = vmul.f32 0.03125, %v1217_v20 }
 0x7a6   :  { %v1220_v23 = vpop.xlane.xlu1 %1219 }
 0x7a7   :  { %v1223_v24 = vadd.f32 1e-06, %v1221_v22  ;;  %v1222_v25 = vmul.f32 0.03125, %v1220_v23 }
 0x7a9   :  { %1705 = vrsqrt.f32 %v1223_v24  ;;  %v1224_v26 = vadd.f32 1e-06, %v1222_v25 }
 0x7ab   :  { %1707 = vrsqrt.f32 %v1224_v26 }
 0x7b3   :  { %v1706_v28 = vpop.eup %1705 }
 0x7b4   :  { %v1227_v30 = vmul.f32 %v1706_v28, %v2053_v10 }
 0x7b5   :  { %v1708_v31 = vpop.eup %1707 }
 0x7b6   :  { %v1228_v32 = vmul.f32 %v1708_v31, %v2056_v13  ;;  %v1233_v33 = vmul.f32 %v1232_v29, %v1227_v30 }
 0x7b8   :  { %v1234_v34 = vmul.f32 %v1232_v29, %v1228_v32 }
 0x7ba   :  { %v1235_v36 = vpack.c.bf16 %v1234_v34, %v1233_v33 }
 0x7bc   :  { %1609 = vmatmul.mubr.msk.bf16.vlgmr.msra.gmra.mrb[36].mxu0 %vm35_vm0, %v1235_v36 }
 0x88f   :  { %v1289_v39 = vpop.f32.mrb[36].mxu0 }
 0x890   :  { %1310 = vrot.lane.b32.xlu0 %v1289_v39, %s1758_s14  ;;  %v1610_v40 = vpop.f32.mrb[37].mxu0  ;;  %v1296_v43 = vsub.f32 0.0, %v1289_v39 }
 0x891   :  { %v1292_v41 = vpop.f32.mrb[38].mxu0 }
 0x892   :  { %1312 = vrot.lane.b32.xlu1 %v1292_v41, %s1758_s14  ;;  %v1611_v42 = vpop.f32.mrb[39].mxu0  ;;  %v1297_v44 = vsub.f32 0.0, %v1292_v41  ;;  %v1298_v35 = vmul.f32 1.442695, %v1296_v43 }
 0x894   :  { %v1300_v45 = vmul.f32 1.442695, %v1297_v44  ;;  %1709 = vpow2.f32 %v1298_v35 }
 0x896   :  { %1711 = vpow2.f32 %v1300_v45 }
 0x89e   :  { %v1710_v46 = vpop.eup %1709 }
 0x89f   :  { %v1302_v47 = vadd.f32 1.0, %v1710_v46 }
 0x8a0   :  { %v1712_v7 = vpop.eup %1711 }
 0x8a1   :  { %v1303_v48 = vadd.f32 1.0, %v1712_v7  ;;  %1713 = vrcp.f32 %v1302_v47 }
 0x8a3   :  { %1715 = vrcp.f32 %v1303_v48 }
 0x8ab   :  { %v1714_v49 = vpop.eup %1713 }
 0x8ac   :  { %v1306_v52 = vmul.f32 %v1714_v49, %v1289_v39 }
 0x8ad   :  { %v1716_v50 = vpop.eup %1715 }
 0x8ae   :  { %v1307_v53 = vmul.f32 %v1716_v50, %v1292_v41 }
 0x902   :  { %v1311_v51 = vpop.permute.xlu0 %1310 }
 0x903   :  { %v1316_v55 = vmul.f32 %v1311_v51, %v1306_v52 }
 0x904   :  { %v1313_v54 = vpop.permute.xlu1 %1312 }
 0x905   :  { %v1317_v56 = vmul.f32 %v1313_v54, %v1307_v53 }
 0x907   :  { %v1318_v57 = vpack.c.bf16 %v1317_v56, %v1316_v55 }
 0x909   :  { %1621 = vmatmul.mubr.msk.bf16.vlgmr.msra.gmra.mrb[36].mxu1 %vm1351_vm8, %v1318_v57 }
 0x9dc   :  { %v1389_v58 = vpop.f32.mrb[36].mxu1 }
 0x9dd   :  { %v1396_v59 = vadd.f32 %v1389_v58, %v2053_v10  ;;  %v1622_v60 = vpop.f32.mrb[37].mxu1 }
 0x9de   :  { %v1392_v61 = vpop.f32.mrb[38].mxu1 }
 0x9df   :  { %1398 = vst.msk [vmem:[#allocation2] sm:$0xff] %vm35_vm0, %v1396_v59  ;;  %v1397_v62 = vadd.f32 %v1392_v61, %v2056_v13  ;;  %v1623_v2 = vpop.f32.mrb[39].mxu1 }
 0x9e1   :  { %1399 = vst.msk [vmem:[#allocation2 + $0x8] sm:$0xff] %vm35_vm0, %v1397_v62 }
 0x9e2   :  { %1728 = shalt.err (!%p1725_p4)
}
 0x9e3   :  { %s1729_s18 = scalar_lea.hbm %s2115_s7, 256 }
 0x9e4   :  { %p1730_p5 = scmp.ne.s32.totalorder %s2115_s7, %s1729_s18  ;;  %p1733_p6 = scmp.lt.u32.totalorder %s1729_s18, %s2115_s7 }
 0x9e6   :  { %p1735_p7 = pnand %p1733_p6, %p1730_p5 }
 0x9e8   :  { %1738 = shalt.err (!%p1735_p7)
}
 0x9e9   :  { %s1760_s23 = smov 128  }
 0x9ea   :  { %1411 = dma.vmem_to_hbm [thread:$0]  %s1406_s2, 256, %s2115_s7, [#allocation3], %s1760_s23, %s1760_s23, %s1745_s13  }
 0x9eb   :  { %1739 = dma.done.wait [#allocation3], 256  }
 0x9ec   :  { %1740 = vsyncadd [#allocation3], 4294967040 }
 0x9ed   :  { %1415 = vsyncpa [#allocation3], 1 }

</bundles_post_ra>
